<compile_context>
chip_gen: v5e
topology: v5e:2x2
jax: 0.10.0
libtpu: 0.0.40
codegen_flags: <defaults>
</compile_context>

<pallas_src>
import functools

import numpy as np

import jax
import jax.numpy as jnp
from jax import lax
from jax.experimental import pallas as pl
from jax.experimental.pallas import tpu as pltpu


def _sigmoid(x):
    # exact formulation, used identically in kernel and reference
    return 1.0 / (1.0 + jnp.exp(-x))


# ---------------------------------------------------------------------------
# Fused kernel (channels-first flattened layout, everything lane-dense):
#   x_ref:    (bblk, Kpad, HW)  input channels + a ones row (bias) + zero pad
#   w1_ref:   (Cmid, Kpad)      conv1 weights with BN scale/bias folded in
#   fc1_ref:  (Cmid, Cr)        SE MLP (transposed, no bias)
#   fc2_ref:  (Cr, Cmid)
#   wavg_ref: (HW, HW)          flat 7x7 conv structure matrix, avg channel
#   wmax_ref: (HW, HW)          flat 7x7 conv structure matrix, max channel
#   wo_ref:   (Cout, Cmid)      final 1x1 conv weights
#   bo_ref:   (Cout, HW)        final 1x1 conv bias, pre-broadcast (lane-dense)
#   o_ref:    (bblk, Cout, HW)  lane-dense output
# ---------------------------------------------------------------------------
def _xcs_fused_kernel(x_ref, w1_ref, fc1_ref, fc2_ref, wavg_ref, wmax_ref,
                      wo_ref, bo_ref, o_ref, *, bblk, cmid, hw):
    # loop-invariant constants hoisted out of the per-element loop
    eye_mask = (lax.broadcasted_iota(jnp.int32, (cmid, cmid), 0)
                == lax.broadcasted_iota(jnp.int32, (cmid, cmid), 1))
    inv_hw = jnp.full((1, hw), 1.0 / hw, jnp.float32)

    for bi in range(bblk):
        x = x_ref[bi]                                            # (Kpad, HW)

        # --- 1x1 conv + folded BN bias (ones row) + ReLU: one MXU matmul ----
        h = jnp.maximum(
            jnp.dot(w1_ref[...], x, preferred_element_type=jnp.float32), 0.0)
        # TODO(synk): Dropout2d(p=0.2) is the identity in inference mode.

        # --- SELayer ---------------------------------------------------------
        # global average pool as a (1,HW)x(Cmid,HW)^T contraction (MXU, row out)
        pooled = lax.dot_general(inv_hw, h, (((1,), (1,)), ((), ())),
                                 preferred_element_type=jnp.float32)  # (1, Cmid)
        z = jnp.maximum(
            jnp.dot(pooled, fc1_ref[...], preferred_element_type=jnp.float32),
            0.0)                                                      # (1, Cr)
        gate = _sigmoid(
            jnp.dot(z, fc2_ref[...], preferred_element_type=jnp.float32))  # (1, Cmid)
        # per-channel gating via diag(gate) @ h on the MXU: avoids any
        # lane<->sublane relayout of the gate vector
        diag_g = jnp.where(eye_mask, gate, 0.0)                       # (Cmid, Cmid)
        se = jnp.dot(diag_g, h, preferred_element_type=jnp.float32)   # (Cmid, HW)

        # --- SpatialAttention -------------------------------------------------
        # channel mean / max: sublane reductions -> lane-dense (1, HW) rows
        mean_r = jnp.mean(se, axis=0, keepdims=True)                  # (1, HW)
        max_r = jnp.max(se, axis=0, keepdims=True)                    # (1, HW)

        # deferred final 1x1 conv (exact reordering: out = sa * (wo @ se) + b)
        out_pre = jnp.dot(wo_ref[...], se,
                          preferred_element_type=jnp.float32)         # (Cout, HW)

        # 7x7 two-input-channel conv as two flat MXU matmuls against
        # wrapper-precomputed banded structure matrices (zero padding baked in)
        conv_r = (jnp.dot(mean_r, wavg_ref[...],
                          preferred_element_type=jnp.float32)
                  + jnp.dot(max_r, wmax_ref[...],
                            preferred_element_type=jnp.float32))      # (1, HW)
        sa = _sigmoid(conv_r) * conv_r                                # (1, HW)

        # TODO(synk): the original PyTorch forward is shape-inconsistent --
        # CSAttention returns a 1-channel map while the final Conv2d expects
        # mlp_dim channels; we broadcast the spatial-attention map over the SE
        # output (CBAM convention), matching the JAX reference below.

        # --- epilogue: lane-dense scale + pre-broadcast bias, lane-dense store
        o_ref[bi] = out_pre * sa + bo_ref[...]


def xcs_fused(x_aug, w1_aug, fc1t, fc2t, wavg, wmax, wo, bo_b, *, bblk):
    B, kpad, HW = x_aug.shape
    Cmid, Cr = fc1t.shape
    Cout = wo.shape[0]
    kern = functools.partial(_xcs_fused_kernel, bblk=bblk, cmid=Cmid, hw=HW)
    return pl.pallas_call(
        kern,
        out_shape=jax.ShapeDtypeStruct((B, Cout, HW), jnp.float32),
        grid_spec=pltpu.PrefetchScalarGridSpec(
            num_scalar_prefetch=0,
            grid=(B // bblk,),
            in_specs=[
                pl.BlockSpec((bblk, kpad, HW), lambda b: (b, 0, 0)),
                pl.BlockSpec((Cmid, kpad), lambda b: (0, 0)),
                pl.BlockSpec((Cmid, Cr), lambda b: (0, 0)),
                pl.BlockSpec((Cr, Cmid), lambda b: (0, 0)),
                pl.BlockSpec((HW, HW), lambda b: (0, 0)),
                pl.BlockSpec((HW, HW), lambda b: (0, 0)),
                pl.BlockSpec((Cout, Cmid), lambda b: (0, 0)),
                pl.BlockSpec((Cout, HW), lambda b: (0, 0)),
            ],
            out_specs=pl.BlockSpec((bblk, Cout, HW), lambda b: (b, 0, 0)),
        ),
        compiler_params=pltpu.CompilerParams(
            dimension_semantics=("parallel",)),
    )(x_aug, w1_aug, fc1t, fc2t, wavg, wmax, wo, bo_b)


# ---------------------------------------------------------------------------
# Parameter init (deterministic, synthetic; PyTorch-conventional shapes)
# ---------------------------------------------------------------------------
def init_params(key, in_features, out_features, mlp_dim=128, reduction=16, ksize=7):
    ks = jax.random.split(key, 11)
    p = {}
    p["conv1_w"] = 0.05 * jax.random.normal(ks[0], (mlp_dim, in_features, 1, 1), jnp.float32)
    p["conv1_b"] = 0.01 * jax.random.normal(ks[1], (mlp_dim,), jnp.float32)
    p["bn_gamma"] = 1.0 + 0.1 * jax.random.normal(ks[2], (mlp_dim,), jnp.float32)
    p["bn_beta"] = 0.1 * jax.random.normal(ks[3], (mlp_dim,), jnp.float32)
    p["bn_mean"] = 0.1 * jax.random.normal(ks[4], (mlp_dim,), jnp.float32)
    p["bn_var"] = 0.5 + jnp.abs(jax.random.normal(ks[5], (mlp_dim,), jnp.float32))
    p["fc1_w"] = 0.05 * jax.random.normal(ks[6], (mlp_dim // reduction, mlp_dim), jnp.float32)
    p["fc2_w"] = 0.05 * jax.random.normal(ks[7], (mlp_dim, mlp_dim // reduction), jnp.float32)
    p["sa_w"] = 0.05 * jax.random.normal(ks[8], (1, 2, ksize, ksize), jnp.float32)
    p["conv2_w"] = 0.05 * jax.random.normal(ks[9], (out_features, mlp_dim, 1, 1), jnp.float32)
    p["conv2_b"] = 0.01 * jax.random.normal(ks[10], (out_features,), jnp.float32)
    return p


# ---------------------------------------------------------------------------
# Top-level wrapper (layout plumbing + one-time parameter folding only)
# ---------------------------------------------------------------------------
def xcs_projector0(x_nchw, params, *, ksize=7, batch_block=None):
    B, Cin, H, W = x_nchw.shape
    Cmid = params["conv1_w"].shape[0]
    Cout = params["conv2_w"].shape[0]
    HW = H * W
    pad = ksize // 2

    # fold BatchNorm (eval mode) into the first 1x1 conv
    scale = params["bn_gamma"] / jnp.sqrt(params["bn_var"] + 1e-5)
    shift = params["bn_beta"] - params["bn_mean"] * scale
    w1f = params["conv1_w"][:, :, 0, 0] * scale[:, None]           # (Cmid, Cin)
    b1f = params["conv1_b"] * scale + shift                        # (Cmid,)

    # fold the bias in as an extra "ones" input row; pad K to a sublane multiple
    kpad = ((Cin + 1 + 7) // 8) * 8
    w1_aug = jnp.zeros((Cmid, kpad), jnp.float32)
    w1_aug = w1_aug.at[:, :Cin].set(w1f).at[:, Cin].set(b1f)
    x_flat = x_nchw.reshape(B, Cin, HW).astype(jnp.float32)        # lane-dense, no transpose
    x_aug = jnp.zeros((B, kpad, HW), jnp.float32)
    x_aug = x_aug.at[:, :Cin, :].set(x_flat).at[:, Cin, :].set(1.0)

    fc1t = jnp.transpose(params["fc1_w"])                          # (Cmid, Cr)
    fc2t = jnp.transpose(params["fc2_w"])                          # (Cr, Cmid)

    # Flatten the 7x7 / 2-input-channel SpatialAttention conv (with zero
    # padding) into two (HW, HW) structure matrices so the kernel can run it
    # as two lane-dense MXU matmuls:  sa_pre = mean_row @ Wavg + max_row @ Wmax
    saw = params["sa_w"][0]                                        # (2, k, k)
    i_idx, j_idx, dh_idx, dw_idx = np.meshgrid(
        np.arange(H), np.arange(W), np.arange(ksize), np.arange(ksize),
        indexing="ij")
    r = i_idx + dh_idx - pad
    s = j_idx + dw_idx - pad
    valid = (r >= 0) & (r < H) & (s >= 0) & (s < W)
    rows = (r * W + s)[valid]                                      # input pixel (contraction)
    cols = (i_idx * W + j_idx)[valid]                              # output pixel
    wavg = jnp.zeros((HW, HW), jnp.float32).at[rows, cols].add(
        saw[0][dh_idx[valid], dw_idx[valid]])
    wmax = jnp.zeros((HW, HW), jnp.float32).at[rows, cols].add(
        saw[1][dh_idx[valid], dw_idx[valid]])

    wo = params["conv2_w"][:, :, 0, 0]                             # (Cout, Cmid)
    # pre-broadcast bias so the epilogue add is a full-vreg lane-dense add
    bo_b = jnp.broadcast_to(params["conv2_b"][:, None], (Cout, HW)).astype(jnp.float32)

    # batch blocking: keep >= 2 grid steps (v7x megacore); amortize per-step
    # overhead on single-TC v5e/v6e when the batch grows.
    if batch_block is None:
        batch_block = 2 if (B > 2 and B % 2 == 0) else 1
    assert B % batch_block == 0, "batch must be divisible by batch_block"

    out = xcs_fused(x_aug, w1_aug, fc1t, fc2t, wavg, wmax, wo, bo_b,
                    bblk=batch_block)                              # (B, Cout, HW)
    return out.reshape(B, Cout, H, W)                              # lane-dense -> NCHW


# ---------------------------------------------------------------------------
# Pure-JAX reference (same math, NCHW) for verification
# ---------------------------------------------------------------------------
def reference(x, p, ksize=7):
    w1 = p["conv1_w"][:, :, 0, 0]
    y = jnp.einsum("bihw,oi->bohw", x, w1) + p["conv1_b"][None, :, None, None]
    scale = p["bn_gamma"] / jnp.sqrt(p["bn_var"] + 1e-5)
    shift = p["bn_beta"] - p["bn_mean"] * scale
    y = jnp.maximum(y * scale[None, :, None, None] + shift[None, :, None, None], 0.0)
    pooled = jnp.mean(y, axis=(2, 3))
    z = jnp.maximum(pooled @ p["fc1_w"].T, 0.0)
    g = _sigmoid(z @ p["fc2_w"].T)
    se = y * g[:, :, None, None]
    avg_c = jnp.mean(se, axis=1, keepdims=True)
    max_c = jnp.max(se, axis=1, keepdims=True)
    cat = jnp.concatenate([avg_c, max_c], axis=1)
    pad = ksize // 2
    a = jax.lax.conv_general_dilated(cat, p["sa_w"], (1, 1), [(pad, pad), (pad, pad)],
                                     dimension_numbers=("NCHW", "OIHW", "NCHW"))
    sa = _sigmoid(a) * a
    attn = se * sa
    w2 = p["conv2_w"][:, :, 0, 0]
    return jnp.einsum("bihw,oi->bohw", attn, w2) + p["conv2_b"][None, :, None, None]


if __name__ == "__main__":
    key = jax.random.PRNGKey(0)
    kx, kp = jax.random.split(key)
    B, Cin, H, W = 2, 4, 16, 16
    out_features = 32
    x = jax.random.normal(kx, (B, Cin, H, W), jnp.float32)
    params = init_params(kp, Cin, out_features)

    out = jax.block_until_ready(xcs_projector0(x, params))
    ref = jax.block_until_ready(reference(x, params))
    assert out.shape == (B, out_features, H, W), out.shape
    err = float(jnp.max(jnp.abs(out - ref)))
    assert jnp.allclose(out, ref, rtol=1e-3, atol=1e-4), err
    print("KERNEL_OK")
</pallas_src>

<mosaic_0001>
module attributes {stable_mosaic.version = 11 : i64} {
  func.func @_xcs_fused_kernel(%arg0: i32, %arg1: memref<1x8x256xf32, #tpu.memory_space<vmem>>, %arg2: memref<128x8xf32, #tpu.memory_space<vmem>>, %arg3: memref<128x8xf32, #tpu.memory_space<vmem>>, %arg4: memref<8x128xf32, #tpu.memory_space<vmem>>, %arg5: memref<256x256xf32, #tpu.memory_space<vmem>>, %arg6: memref<256x256xf32, #tpu.memory_space<vmem>>, %arg7: memref<32x128xf32, #tpu.memory_space<vmem>>, %arg8: memref<32x256xf32, #tpu.memory_space<vmem>>, %arg9: memref<1x32x256xf32, #tpu.memory_space<vmem>>) attributes {dimension_semantics = [#tpu.dimension_semantics<parallel>], iteration_bounds = array<i64: 2>, scalar_prefetch = 0 : i64, scratch_operands = 0 : i64, tpu.core_type = #tpu.core_type<tc>, window_params = [{transform_indices = @transform_0, window_bounds = array<i64: 1, 8, 256>}, {pipeline_mode = #tpu.pipeline_mode<synchronous>, transform_indices = @transform_1, window_bounds = array<i64: 128, 8>}, {pipeline_mode = #tpu.pipeline_mode<synchronous>, transform_indices = @transform_2, window_bounds = array<i64: 128, 8>}, {pipeline_mode = #tpu.pipeline_mode<synchronous>, transform_indices = @transform_3, window_bounds = array<i64: 8, 128>}, {pipeline_mode = #tpu.pipeline_mode<synchronous>, transform_indices = @transform_4, window_bounds = array<i64: 256, 256>}, {pipeline_mode = #tpu.pipeline_mode<synchronous>, transform_indices = @transform_5, window_bounds = array<i64: 256, 256>}, {pipeline_mode = #tpu.pipeline_mode<synchronous>, transform_indices = @transform_6, window_bounds = array<i64: 32, 128>}, {pipeline_mode = #tpu.pipeline_mode<synchronous>, transform_indices = @transform_7, window_bounds = array<i64: 32, 256>}, {transform_indices = @transform_8, window_bounds = array<i64: 1, 32, 256>}]} {
    %0 = tpu.iota {dimensions = array<i32: 0>} : vector<128x128xi32>
    %1 = tpu.iota {dimensions = array<i32: 1>} : vector<128x128xi32>
    %2 = arith.cmpi eq, %0, %1 : vector<128x128xi32>
    %cst = arith.constant 3.906250e-03 : f32
    %3 = vector.broadcast %cst : f32 to vector<1x256xf32>
    %c0 = arith.constant 0 : index
    %c0_0 = arith.constant 0 : index
    %c0_1 = arith.constant 0 : index
    %4 = vector.load %arg1[%c0, %c0_0, %c0_1] : memref<1x8x256xf32, #tpu.memory_space<vmem>>, vector<1x8x256xf32>
    %5 = vector.shape_cast %4 : vector<1x8x256xf32> to vector<8x256xf32>
    %c0_2 = arith.constant 0 : index
    %c0_3 = arith.constant 0 : index
    %6 = vector.load %arg2[%c0_2, %c0_3] : memref<128x8xf32, #tpu.memory_space<vmem>>, vector<128x8xf32>
    %cst_4 = arith.constant dense<0.000000e+00> : vector<128x256xf32>
    %7 = tpu.matmul %6, %5, %cst_4 {dimension_numbers = #tpu.dot_dimension_numbers<[1], [0], [0], [1], [0, 0, 1, 1], [], []>} : vector<128x8xf32>, vector<8x256xf32>, vector<128x256xf32> -> vector<128x256xf32>
    %cst_5 = arith.constant 0.000000e+00 : f32
    %8 = vector.broadcast %cst_5 : f32 to vector<128x256xf32>
    %9 = arith.maximumf %7, %8 : vector<128x256xf32>
    %cst_6 = arith.constant dense<0.000000e+00> : vector<1x128xf32>
    %10 = tpu.matmul %3, %9, %cst_6 {dimension_numbers = #tpu.dot_dimension_numbers<[1], [1], [0], [0], [0, 0, 1, 0], [], []>} : vector<1x256xf32>, vector<128x256xf32>, vector<1x128xf32> -> vector<1x128xf32>
    %c0_7 = arith.constant 0 : index
    %c0_8 = arith.constant 0 : index
    %11 = vector.load %arg3[%c0_7, %c0_8] : memref<128x8xf32, #tpu.memory_space<vmem>>, vector<128x8xf32>
    %cst_9 = arith.constant dense<0.000000e+00> : vector<1x8xf32>
    %12 = tpu.matmul %10, %11, %cst_9 {dimension_numbers = #tpu.dot_dimension_numbers<[1], [0], [0], [1], [0, 0, 1, 1], [], []>} : vector<1x128xf32>, vector<128x8xf32>, vector<1x8xf32> -> vector<1x8xf32>
    %cst_10 = arith.constant 0.000000e+00 : f32
    %13 = vector.broadcast %cst_10 : f32 to vector<1x8xf32>
    %14 = arith.maximumf %12, %13 : vector<1x8xf32>
    %c0_11 = arith.constant 0 : index
    %c0_12 = arith.constant 0 : index
    %15 = vector.load %arg4[%c0_11, %c0_12] : memref<8x128xf32, #tpu.memory_space<vmem>>, vector<8x128xf32>
    %cst_13 = arith.constant dense<0.000000e+00> : vector<1x128xf32>
    %16 = tpu.matmul %14, %15, %cst_13 {dimension_numbers = #tpu.dot_dimension_numbers<[1], [0], [0], [1], [0, 0, 1, 1], [], []>} : vector<1x8xf32>, vector<8x128xf32>, vector<1x128xf32> -> vector<1x128xf32>
    %cst_14 = arith.constant 0.000000e+00 : f32
    %17 = vector.broadcast %cst_14 : f32 to vector<1x128xf32>
    %18 = arith.subf %17, %16 : vector<1x128xf32>
    %19 = math.exp %18 : vector<1x128xf32>
    %cst_15 = arith.constant 1.000000e+00 : f32
    %20 = vector.broadcast %cst_15 : f32 to vector<1x128xf32>
    %21 = arith.addf %20, %19 : vector<1x128xf32>
    %cst_16 = arith.constant 1.000000e+00 : f32
    %22 = vector.broadcast %cst_16 : f32 to vector<1x128xf32>
    %23 = arith.divf %22, %21 : vector<1x128xf32>
    %cst_17 = arith.constant 0.000000e+00 : f32
    %24 = vector.shape_cast %23 : vector<1x128xf32> to vector<1x128xf32>
    %25 = vector.broadcast %24 : vector<1x128xf32> to vector<128x128xf32>
    %26 = vector.broadcast %cst_17 : f32 to vector<128x128xf32>
    %27 = arith.select %2, %25, %26 : vector<128x128xi1>, vector<128x128xf32>
    %cst_18 = arith.constant dense<0.000000e+00> : vector<128x256xf32>
    %28 = tpu.matmul %27, %9, %cst_18 {dimension_numbers = #tpu.dot_dimension_numbers<[1], [0], [0], [1], [0, 0, 1, 1], [], []>} : vector<128x128xf32>, vector<128x256xf32>, vector<128x256xf32> -> vector<128x256xf32>
    %cst_19 = arith.constant dense<0.000000e+00> : vector<256xf32>
    %29 = vector.multi_reduction <add>, %28, %cst_19 [0] : vector<128x256xf32> to vector<256xf32>
    %30 = vector.shape_cast %29 : vector<256xf32> to vector<1x256xf32>
    %cst_20 = arith.constant 1.280000e+02 : f32
    %31 = vector.broadcast %cst_20 : f32 to vector<1x256xf32>
    %32 = arith.divf %30, %31 : vector<1x256xf32>
    %cst_21 = arith.constant dense<0xFF800000> : vector<256xf32>
    %33 = vector.multi_reduction <maximumf>, %28, %cst_21 [0] : vector<128x256xf32> to vector<256xf32>
    %34 = vector.shape_cast %33 : vector<256xf32> to vector<1x256xf32>
    %c0_22 = arith.constant 0 : index
    %c0_23 = arith.constant 0 : index
    %35 = vector.load %arg7[%c0_22, %c0_23] : memref<32x128xf32, #tpu.memory_space<vmem>>, vector<32x128xf32>
    %cst_24 = arith.constant dense<0.000000e+00> : vector<32x256xf32>
    %36 = tpu.matmul %35, %28, %cst_24 {dimension_numbers = #tpu.dot_dimension_numbers<[1], [0], [0], [1], [0, 0, 1, 1], [], []>} : vector<32x128xf32>, vector<128x256xf32>, vector<32x256xf32> -> vector<32x256xf32>
    %c0_25 = arith.constant 0 : index
    %c0_26 = arith.constant 0 : index
    %37 = vector.load %arg5[%c0_25, %c0_26] : memref<256x256xf32, #tpu.memory_space<vmem>>, vector<256x256xf32>
    %cst_27 = arith.constant dense<0.000000e+00> : vector<1x256xf32>
    %38 = tpu.matmul %32, %37, %cst_27 {dimension_numbers = #tpu.dot_dimension_numbers<[1], [0], [0], [1], [0, 0, 1, 1], [], []>} : vector<1x256xf32>, vector<256x256xf32>, vector<1x256xf32> -> vector<1x256xf32>
    %c0_28 = arith.constant 0 : index
    %c0_29 = arith.constant 0 : index
    %39 = vector.load %arg6[%c0_28, %c0_29] : memref<256x256xf32, #tpu.memory_space<vmem>>, vector<256x256xf32>
    %cst_30 = arith.constant dense<0.000000e+00> : vector<1x256xf32>
    %40 = tpu.matmul %34, %39, %cst_30 {dimension_numbers = #tpu.dot_dimension_numbers<[1], [0], [0], [1], [0, 0, 1, 1], [], []>} : vector<1x256xf32>, vector<256x256xf32>, vector<1x256xf32> -> vector<1x256xf32>
    %41 = arith.addf %38, %40 : vector<1x256xf32>
    %cst_31 = arith.constant 0.000000e+00 : f32
    %42 = vector.broadcast %cst_31 : f32 to vector<1x256xf32>
    %43 = arith.subf %42, %41 : vector<1x256xf32>
    %44 = math.exp %43 : vector<1x256xf32>
    %cst_32 = arith.constant 1.000000e+00 : f32
    %45 = vector.broadcast %cst_32 : f32 to vector<1x256xf32>
    %46 = arith.addf %45, %44 : vector<1x256xf32>
    %cst_33 = arith.constant 1.000000e+00 : f32
    %47 = vector.broadcast %cst_33 : f32 to vector<1x256xf32>
    %48 = arith.divf %47, %46 : vector<1x256xf32>
    %49 = arith.mulf %48, %41 : vector<1x256xf32>
    %50 = vector.broadcast %49 : vector<1x256xf32> to vector<32x256xf32>
    %51 = arith.mulf %36, %50 : vector<32x256xf32>
    %c0_34 = arith.constant 0 : index
    %c0_35 = arith.constant 0 : index
    %52 = vector.load %arg8[%c0_34, %c0_35] : memref<32x256xf32, #tpu.memory_space<vmem>>, vector<32x256xf32>
    %53 = arith.addf %51, %52 : vector<32x256xf32>
    %c0_36 = arith.constant 0 : index
    %c0_37 = arith.constant 0 : index
    %c0_38 = arith.constant 0 : index
    %54 = vector.load %arg9[%c0_36, %c0_37, %c0_38] : memref<1x32x256xf32, #tpu.memory_space<vmem>>, vector<1x32x256xf32>
    %55 = vector.shape_cast %54 : vector<1x32x256xf32> to vector<32x256xf32>
    %56 = vector.shape_cast %53 : vector<32x256xf32> to vector<1x32x256xf32>
    tpu.vector_store %arg9[%c0_36, %c0_37, %c0_38], %56 {strides = array<i32>} : memref<1x32x256xf32, #tpu.memory_space<vmem>>, vector<1x32x256xf32>,
    return
  }
  func.func @transform_0(%arg0: i32) -> (i32, i32, i32) {
    %c0_i32 = arith.constant 0 : i32
    %c0_i32_0 = arith.constant 0 : i32
    %c0_i32_1 = arith.constant 0 : i32
    return %arg0, %c0_i32, %c0_i32_0 : i32, i32, i32
  }
  func.func @transform_1(%arg0: i32) -> (i32, i32) {
    %c0_i32 = arith.constant 0 : i32
    %c0_i32_0 = arith.constant 0 : i32
    %c0_i32_1 = arith.constant 0 : i32
    return %c0_i32, %c0_i32_0 : i32, i32
  }
  func.func @transform_2(%arg0: i32) -> (i32, i32) {
    %c0_i32 = arith.constant 0 : i32
    %c0_i32_0 = arith.constant 0 : i32
    %c0_i32_1 = arith.constant 0 : i32
    return %c0_i32, %c0_i32_0 : i32, i32
  }
  func.func @transform_3(%arg0: i32) -> (i32, i32) {
    %c0_i32 = arith.constant 0 : i32
    %c0_i32_0 = arith.constant 0 : i32
    %c0_i32_1 = arith.constant 0 : i32
    return %c0_i32, %c0_i32_0 : i32, i32
  }
  func.func @transform_4(%arg0: i32) -> (i32, i32) {
    %c0_i32 = arith.constant 0 : i32
    %c0_i32_0 = arith.constant 0 : i32
    %c0_i32_1 = arith.constant 0 : i32
    return %c0_i32, %c0_i32_0 : i32, i32
  }
  func.func @transform_5(%arg0: i32) -> (i32, i32) {
    %c0_i32 = arith.constant 0 : i32
    %c0_i32_0 = arith.constant 0 : i32
    %c0_i32_1 = arith.constant 0 : i32
    return %c0_i32, %c0_i32_0 : i32, i32
  }
  func.func @transform_6(%arg0: i32) -> (i32, i32) {
    %c0_i32 = arith.constant 0 : i32
    %c0_i32_0 = arith.constant 0 : i32
    %c0_i32_1 = arith.constant 0 : i32
    return %c0_i32, %c0_i32_0 : i32, i32
  }
  func.func @transform_7(%arg0: i32) -> (i32, i32) {
    %c0_i32 = arith.constant 0 : i32
    %c0_i32_0 = arith.constant 0 : i32
    %c0_i32_1 = arith.constant 0 : i32
    return %c0_i32, %c0_i32_0 : i32, i32
  }
  func.func @transform_8(%arg0: i32) -> (i32, i32, i32) {
    %c0_i32 = arith.constant 0 : i32
    %c0_i32_0 = arith.constant 0 : i32
    %c0_i32_1 = arith.constant 0 : i32
    return %arg0, %c0_i32, %c0_i32_0 : i32, i32, i32
  }
}

</mosaic_0001>

<bundles_post_ra>
// kernel: tpu_custom_call.1
= control target key start
LH: loop header
LB: loop body
LE: loop exit
PB: predicated region body
PF: predicated region fallthrough
CT: control target
= control target key end

     0   :  { %13 = vsyncpa [#allocation3], 0  ;;  %s2551_s0 = inlined_call_operand.vmem [shape: f32[2,8,256], index: 0, kind: input, shape index: {}]   ;;  %s2552_s1 = inlined_call_operand.vmem [shape: f32[128,8], index: 1, kind: input, shape index: {}]   ;;  %s2553_s2 = inlined_call_operand.vmem [shape: f32[128,8], index: 2, kind: input, shape index: {}]   ;;  %s2554_s3 = inlined_call_operand.vmem [shape: f32[8,128], index: 3, kind: input, shape index: {}]   ;;  %s2555_s4 = inlined_call_operand.hbm [shape: f32[256,256], index: 4, kind: input, shape index: {}]   ;;  %s2556_s5 = inlined_call_operand.hbm [shape: f32[256,256], index: 5, kind: input, shape index: {}]   ;;  %s2557_s6 = inlined_call_operand.vmem [shape: f32[32,128], index: 6, kind: input, shape index: {}]   ;;  %s2558_s7 = inlined_call_operand.vmem [shape: f32[32,256], index: 7, kind: input, shape index: {}]   ;;  %s2559_s8 = inlined_call_operand.hbm [shape: f32[2,32,256], index: 8, kind: output, shape index: {}]  }
   0x1   :  { %14 = vsyncpa [#allocation6], 0 }
   0x2   :  { %15 = vsyncpa [#allocation4], 0 }
   0x3   :  { %17 = vsyncpa [#allocation4 + $0x1], 0  ;;  %s1834_s27 = smov 0   ;;  %s1836_s28 = smov 0  }
   0x4   :  { %s1838_s29 = smov 0   ;;  %s1840_s30 = smov 0  }
   0x5 LB: > { %s1855_s9 = sadd.s32 4294967295, %s1779_s30   ;;  %s1486_s10 = sadd.s32 4294967294, %s1779_s30   ;;  %s1779_s30 = sphi %s1840_s30, %s2566_s30   ;;  %s1775_s29 = sphi %s1838_s29, %s2565_s29   ;;  %s1771_s28 = sphi %s1836_s28, %s2564_s28   ;;  %s1767_s27 = sphi %s1834_s27, %s2563_s27  }
   0x6   : > { %s1859_s11 = sadd.s32 1, %s1779_s30   ;;  %s203_s12 = sadd.s32 1, %s1775_s29 }
   0x7   : > { %s200_s13 = ssub.s32 %s1779_s30, %s1859_s11  ;;  %p213_p0 = scmp.ne.s32.totalorder %s1775_s29, %s1771_s28 }
   0x8   : > { %p201_p1 = scmp.eq.s32.totalorder %s200_s13, 0  ;;  %p214_p2 = scmp.eq.s32.totalorder %s1855_s9, 1 }
   0x9   : > { %p219_p3 = scmp.ne.s32.totalorder %s1771_s28, %s1767_s27  ;;  %p220_p4 = scmp.eq.s32.totalorder %s1486_s10, 1 }
   0xa   : > { %s1870_s14 = scalar_select %p201_p1, %s1775_s29, %s203_s12  }
   0xb   : > { %p1872_p5 = por %p214_p2, %p213_p0  ;;  %p1876_p6 = por %p220_p4, %p219_p3 }
   0xc   : > { %p1487_p7 = scmp.ge.s32.totalorder %s1779_s30, 1  ;;  %p227_p8 = scmp.lt.s32.totalorder %s1779_s30, 3 }
   0xd   : > { %p1590_p9 = scmp.eq.s32.totalorder %s1855_s9, 0  ;;  %s247_s20 = sshll.u32 %s2555_s4, 4  ;;  %s248_s20 = int_to_ptr.hbm [resolvable:$true] %s247_s20 }
   0xe   : > { %p1883_p10 = pnand %p1487_p7, %p227_p8  ;;  %s1781_s21 = smov [#allocation2]  }
   0xf   : > { %s249_s22 = sshll.u32 %s1781_s21, 4  ;;  %s261_s25 = sshll.u32 %s2556_s5, 4  ;;  %s250_s22 = int_to_ptr.vmem [resolvable:$true] %s249_s22  ;;  %s262_s25 = int_to_ptr.hbm [resolvable:$true] %s261_s25 }
  0x10   : > { %p1579_p11 = pneg %p1883_p10  ;;  %s1782_s26 = smov 256  }
  0x11   : > { %s1783_s10 = smov 16   ;;  %s1784_s12 = smov [#allocation5]  }
  0x12   : > { %p1580_p12 = pnand %p1590_p9, %p1579_p11  ;;  %s263_s13 = sshll.u32 %s1784_s12, 4  ;;  %s264_s13 = int_to_ptr.vmem [resolvable:$true] %s263_s13 }
  0x13   : > { %293 = sbr.rel (%p1883_p10) target bundleno = 1332 (0x534), region = 52 }
  0x14   : > { %1582 = dma.hbm_to_vmem [thread:$0]  (!%p1580_p12), %s248_s20, 8192, %s250_s22, [#allocation3], %s1782_s26, %s1782_s26, %s1783_s10  }
  0x15   : > { %1585 = dma.hbm_to_vmem [thread:$0]  (!%p1580_p12), %s262_s25, 8192, %s264_s13, [#allocation6], %s1782_s26, %s1782_s26, %s1783_s10  }
  0x18   : > { %1754 = dma.done.wait (%p1590_p9), [#allocation3], 8192  }
  0x19   : > { %1756 = vsyncadd (%p1590_p9), [#allocation3], 4294959104 }
  0x1a   : > { %1758 = dma.done.wait (%p1590_p9), [#allocation6], 8192  }
  0x1b   : > { %1760 = vsyncadd (%p1590_p9), [#allocation6], 4294959104  ;;  %p333_p13 = scmp.lt.s32.totalorder %s1855_s9, 1  ;;  %vm391_vm0 = vcmask 64512   ;;  %v375_v2 = vld [vmem:[%s2552_s1] sm:$0xff]  ;;  %v376_v3 = vld [vmem:[%s2552_s1 + $0x8] sm:$0xff] }
  0x1c   : > { %v377_v4 = vld [vmem:[%s2552_s1 + $0x10] sm:$0xff]  ;;  %v378_v5 = vld [vmem:[%s2552_s1 + $0x18] sm:$0xff]  ;;  %v379_v6 = vld [vmem:[%s2552_s1 + $0x20] sm:$0xff]  ;;  %s1568_s13 = sshll.u32 %s1855_s9, 6  ;;  %s1729_s24 = scalar_lea.hbm %s2559_s8, 128 }
  0x1d   : > { %s334_s18 = scalar_select %p333_p13, %s1855_s9, 1  ;;  %v380_v7 = vld [vmem:[%s2552_s1 + $0x28] sm:$0xff]  ;;  %v381_v8 = vld [vmem:[%s2552_s1 + $0x30] sm:$0xff]  ;;  %v382_v9 = vld [vmem:[%s2552_s1 + $0x38] sm:$0xff] }
  0x1e   : > { %v383_v10 = vld [vmem:[%s2552_s1 + $0x40] sm:$0xff]  ;;  %v384_v11 = vld [vmem:[%s2552_s1 + $0x48] sm:$0xff]  ;;  %v385_v12 = vld [vmem:[%s2552_s1 + $0x50] sm:$0xff]  ;;  %s1398_s17 = scalar_lea.hbm %s2559_s8, %s1568_s13 }
  0x1f   : > { %s1567_s19 = sshll.u32 %s334_s18, 4  ;;  %v386_v13 = vld [vmem:[%s2552_s1 + $0x58] sm:$0xff]  ;;  %v387_v14 = vld [vmem:[%s2552_s1 + $0x60] sm:$0xff]  ;;  %v388_v15 = vld [vmem:[%s2552_s1 + $0x68] sm:$0xff]  ;;  %s1401_s18 = sshll.u32 %s1398_s17, 4  ;;  %s1402_s18 = int_to_ptr.hbm [resolvable:$true] %s1401_s18 }
  0x20   : > { %s337_s21 = scalar_lea.vmem %s2551_s0, %s1567_s19  ;;  %v389_v16 = vld [vmem:[%s2552_s1 + $0x70] sm:$0xff]  ;;  %v390_v17 = vld [vmem:[%s2552_s1 + $0x78] sm:$0xff]  ;;  %s330_s19 = sand.u32 1, %s1771_s28  }
  0x21   : > { %v373_v0 = vld [vmem:[%s337_s21] sm:$0xff]  ;;  %v374_v1 = vld [vmem:[%s337_s21 + $0x8] sm:$0xff]  ;;  %s1494_s20 = sshll.u32 %s330_s19, 6  ;;  %s1723_s21 = sshra.s32 %s1402_s18, 4  ;;  %s1724_s21 = int_to_ptr.hbm [resolvable:$true] %s1723_s21 }
  0x22   : > { %455 = vmatpush.msra.mxu0 %v373_v0  ;;  %520 = vmatpush.msra.mxu1 %v374_v1  ;;  %s2491_s12 = scalar_lea.vmem [#allocation7], %s1494_s20  ;;  %s1387_s20 = scalar_lea.sflag [#allocation4], %s330_s19 }
  0x23   : > { %1497 = vmatmul.msk.f32.vlgmr.msra.gmra.mxu0 %vm391_vm0, %v375_v2  ;;  %1513 = vmatmul.msk.f32.vlgmr.msra.gmra.mxu1 %vm391_vm0, %v375_v2  ;;  %s1399_s13 = sshll.u32 %s2491_s12, 4  ;;  %s1725_s22 = scalar_lea.hbm %s1724_s21, 64  ;;  %s1400_s13 = int_to_ptr.vmem [resolvable:$true] %s1399_s13 }
  0x24   : > { %p1726_p0 = scmp.ne.s32.totalorder %s1724_s21, %s1725_s22  ;;  %p1730_p3 = scmp.lt.s32.totalorder %s1724_s21, %s2559_s8 }
  0x25   : > { %p1731_p4 = scmp.lt.s32.totalorder %s1729_s24, %s1725_s22 }
  0x26   : > { %p1727_p1 = pnand %p1726_p0, %p1872_p5 }
  0x27   : > { %p1732_p7 = por %p1731_p4, %p1730_p3 }
  0x28   : > { %p1728_p2 = pneg %p1727_p1 }
  0x2a   : > { %p1733_p8 = pnand %p1732_p7, %p1728_p2 }
  0x2b   : > { %1498 = vmatmul.msk.f32.gmra.mxu0 %vm391_vm0, %v376_v3  ;;  %1514 = vmatmul.msk.f32.gmra.mxu1 %vm391_vm0, %v376_v3 }
  0x33   : > { %1499 = vmatmul.msk.f32.gmra.mxu0 %vm391_vm0, %v377_v4  ;;  %1515 = vmatmul.msk.f32.gmra.mxu1 %vm391_vm0, %v377_v4 }
  0x3b   : > { %1500 = vmatmul.msk.f32.gmra.mxu0 %vm391_vm0, %v378_v5  ;;  %1516 = vmatmul.msk.f32.gmra.mxu1 %vm391_vm0, %v378_v5 }
  0x43   : > { %1501 = vmatmul.msk.f32.gmra.mxu0 %vm391_vm0, %v379_v6  ;;  %1517 = vmatmul.msk.f32.gmra.mxu1 %vm391_vm0, %v379_v6 }
  0x4b   : > { %1502 = vmatmul.msk.f32.gmra.mxu0 %vm391_vm0, %v380_v7  ;;  %1518 = vmatmul.msk.f32.gmra.mxu1 %vm391_vm0, %v380_v7 }
  0x53   : > { %1503 = vmatmul.msk.f32.gmra.mxu0 %vm391_vm0, %v381_v8  ;;  %1519 = vmatmul.msk.f32.gmra.mxu1 %vm391_vm0, %v381_v8 }
  0x5b   : > { %1504 = vmatmul.msk.f32.gmra.mxu0 %vm391_vm0, %v382_v9  ;;  %1520 = vmatmul.msk.f32.gmra.mxu1 %vm391_vm0, %v382_v9 }
  0x63   : > { %1505 = vmatmul.msk.f32.gmra.mxu0 %vm391_vm0, %v383_v10  ;;  %1521 = vmatmul.msk.f32.gmra.mxu1 %vm391_vm0, %v383_v10 }
  0x6b   : > { %1506 = vmatmul.msk.f32.gmra.mxu0 %vm391_vm0, %v384_v11  ;;  %1522 = vmatmul.msk.f32.gmra.mxu1 %vm391_vm0, %v384_v11 }
  0x73   : > { %1507 = vmatmul.msk.f32.gmra.mxu0 %vm391_vm0, %v385_v12  ;;  %1523 = vmatmul.msk.f32.gmra.mxu1 %vm391_vm0, %v385_v12 }
  0x7b   : > { %1508 = vmatmul.msk.f32.gmra.mxu0 %vm391_vm0, %v386_v13  ;;  %1524 = vmatmul.msk.f32.gmra.mxu1 %vm391_vm0, %v386_v13 }
  0x83   : > { %1509 = vmatmul.msk.f32.gmra.mxu0 %vm391_vm0, %v387_v14  ;;  %1525 = vmatmul.msk.f32.gmra.mxu1 %vm391_vm0, %v387_v14 }
  0x8b   : > { %1510 = vmatmul.msk.f32.gmra.mxu0 %vm391_vm0, %v388_v15  ;;  %1526 = vmatmul.msk.f32.gmra.mxu1 %vm391_vm0, %v388_v15 }
  0x93   : > { %1511 = vmatmul.msk.f32.gmra.mxu0 %vm391_vm0, %v389_v16  ;;  %1527 = vmatmul.msk.f32.gmra.mxu1 %vm391_vm0, %v389_v16 }
  0x9b   : > { %1512 = vmatmul.msk.f32.gmra.mxu0 %vm391_vm0, %v390_v17  ;;  %1528 = vmatmul.msk.f32.gmra.mxu1 %vm391_vm0, %v390_v17 }
  0xa0   : > { %v1992_v18 = vpop.f32.mrf.mxu0  ;;  %v1994_v19 = vpop.f32.mrf.mxu1 }
  0xa1   : > { %v570_v16 = vmax.f32 %v1992_v18, 0.0  ;;  %v571_v17 = vmax.f32 %v1994_v19, 0.0  ;;  %v1785_v18 = vmov 0.00390625  }
  0xa8   : > { %v1996_v20 = vpop.f32.mrf.mxu0  ;;  %v1998_v21 = vpop.f32.mrf.mxu1 }
  0xa9   : > { %v572_v14 = vmax.f32 %v1996_v20, 0.0  ;;  %v573_v15 = vmax.f32 %v1998_v21, 0.0  ;;  %v656_v20 = vld [vmem:[%s2553_s2 + $0x70] sm:$0xff] }
  0xb0   : > { %v2000_v22 = vpop.f32.mrf.mxu0  ;;  %v2002_v23 = vpop.f32.mrf.mxu1 }
  0xb1   : > { %v574_v12 = vmax.f32 %v2000_v22, 0.0  ;;  %v575_v13 = vmax.f32 %v2002_v23, 0.0  ;;  %v657_v22 = vld [vmem:[%s2553_s2 + $0x78] sm:$0xff] }
  0xb8   : > { %v2004_v24 = vpop.f32.mrf.mxu0  ;;  %v2006_v25 = vpop.f32.mrf.mxu1 }
  0xb9   : > { %v576_v10 = vmax.f32 %v2004_v24, 0.0  ;;  %v577_v11 = vmax.f32 %v2006_v25, 0.0  ;;  %v679_v24 = vld [vmem:[%s2554_s3] sm:$0xff] }
  0xc0   : > { %v2008_v26 = vpop.f32.mrf.mxu0  ;;  %v2010_v27 = vpop.f32.mrf.mxu1 }
  0xc1   : > { %v578_v8 = vmax.f32 %v2008_v26, 0.0  ;;  %v579_v9 = vmax.f32 %v2010_v27, 0.0  ;;  %v655_v26 = vld [vmem:[%s2553_s2 + $0x68] sm:$0xff] }
  0xc8   : > { %v2012_v28 = vpop.f32.mrf.mxu0  ;;  %v2014_v29 = vpop.f32.mrf.mxu1 }
  0xc9   : > { %v580_v6 = vmax.f32 %v2012_v28, 0.0  ;;  %v581_v7 = vmax.f32 %v2014_v29, 0.0 }
  0xd0   : > { %v2016_v30 = vpop.f32.mrf.mxu0  ;;  %v2018_v31 = vpop.f32.mrf.mxu1 }
  0xd1   : > { %v582_v4 = vmax.f32 %v2016_v30, 0.0  ;;  %v583_v5 = vmax.f32 %v2018_v31, 0.0  ;;  %v642_v30 = vld [vmem:[%s2553_s2] sm:$0xff] }
  0xd8   : > { %v2020_v32 = vpop.f32.mrf.mxu0  ;;  %v2022_v33 = vpop.f32.mrf.mxu1 }
  0xd9   : > { %v584_v2 = vmax.f32 %v2020_v32, 0.0  ;;  %v585_v3 = vmax.f32 %v2022_v33, 0.0  ;;  %v644_v32 = vld [vmem:[%s2553_s2 + $0x10] sm:$0xff] }
  0xe0   : > { %v2024_v34 = vpop.f32.mrf.mxu0  ;;  %v2026_v35 = vpop.f32.mrf.mxu1 }
  0xe1   : > { %v586_v0 = vmax.f32 %v2024_v34, 0.0  ;;  %v587_v1 = vmax.f32 %v2026_v35, 0.0  ;;  %v645_v34 = vld [vmem:[%s2553_s2 + $0x18] sm:$0xff] }
  0xe8   : > { %v2028_v36 = vpop.f32.mrf.mxu0  ;;  %v2030_v37 = vpop.f32.mrf.mxu1 }
  0xe9   : > { %v588_v62 = vmax.f32 %v2028_v36, 0.0  ;;  %v589_v63 = vmax.f32 %v2030_v37, 0.0  ;;  %v646_v36 = vld [vmem:[%s2553_s2 + $0x20] sm:$0xff] }
  0xf0   : > { %v2032_v38 = vpop.f32.mrf.mxu0  ;;  %v2034_v39 = vpop.f32.mrf.mxu1 }
  0xf1   : > { %v590_v60 = vmax.f32 %v2032_v38, 0.0  ;;  %v591_v61 = vmax.f32 %v2034_v39, 0.0  ;;  %v647_v38 = vld [vmem:[%s2553_s2 + $0x28] sm:$0xff] }
  0xf8   : > { %v2036_v40 = vpop.f32.mrf.mxu0  ;;  %v2038_v41 = vpop.f32.mrf.mxu1 }
  0xf9   : > { %v592_v58 = vmax.f32 %v2036_v40, 0.0  ;;  %v593_v59 = vmax.f32 %v2038_v41, 0.0  ;;  %v648_v40 = vld [vmem:[%s2553_s2 + $0x30] sm:$0xff] }
 0x100   : > { %v2040_v42 = vpop.f32.mrf.mxu0  ;;  %v2042_v43 = vpop.f32.mrf.mxu1 }
 0x101   : > { %v594_v56 = vmax.f32 %v2040_v42, 0.0  ;;  %v595_v57 = vmax.f32 %v2042_v43, 0.0  ;;  %v649_v42 = vld [vmem:[%s2553_s2 + $0x38] sm:$0xff]  ;;  %v338_v43 = vlaneseq }
 0x108   : > { %v2044_v44 = vpop.f32.mrf.mxu0  ;;  %v2046_v45 = vpop.f32.mrf.mxu1 }
 0x109   : > { %v596_v54 = vmax.f32 %v2044_v44, 0.0  ;;  %v597_v55 = vmax.f32 %v2046_v45, 0.0  ;;  %v650_v44 = vld [vmem:[%s2553_s2 + $0x40] sm:$0xff] }
 0x110   : > { %v2048_v46 = vpop.f32.mrf.mxu0  ;;  %v2050_v47 = vpop.f32.mrf.mxu1 }
 0x111   : > { %v598_v52 = vmax.f32 %v2048_v46, 0.0  ;;  %v599_v53 = vmax.f32 %v2050_v47, 0.0  ;;  %v651_v46 = vld [vmem:[%s2553_s2 + $0x48] sm:$0xff] }
 0x118   : > { %v2052_v48 = vpop.f32.mrf.mxu0  ;;  %v2054_v49 = vpop.f32.mrf.mxu1 }
 0x119   : > { %v600_v50 = vmax.f32 %v2052_v48, 0.0  ;;  %v601_v51 = vmax.f32 %v2054_v49, 0.0  ;;  %v652_v48 = vld [vmem:[%s2553_s2 + $0x50] sm:$0xff] }
 0x11b   : > { %602 = vmatpush.xpose.msra.mxu2 %v600_v50  ;;  %622 = vmatpush.xpose.msra.mxu3 %v601_v51 }
 0x11f   : > { %603 = vmatpush.xpose.msra.mxu2 %v598_v52  ;;  %623 = vmatpush.xpose.msra.mxu3 %v599_v53 }
 0x123   : > { %604 = vmatpush.xpose.msra.mxu2 %v596_v54  ;;  %624 = vmatpush.xpose.msra.mxu3 %v597_v55 }
 0x127   : > { %605 = vmatpush.xpose.msra.mxu2 %v594_v56  ;;  %625 = vmatpush.xpose.msra.mxu3 %v595_v57 }
 0x12b   : > { %606 = vmatpush.xpose.msra.mxu2 %v592_v58  ;;  %626 = vmatpush.xpose.msra.mxu3 %v593_v59 }
 0x12f   : > { %607 = vmatpush.xpose.msra.mxu2 %v590_v60  ;;  %627 = vmatpush.xpose.msra.mxu3 %v591_v61 }
 0x133   : > { %608 = vmatpush.xpose.msra.mxu2 %v588_v62  ;;  %628 = vmatpush.xpose.msra.mxu3 %v589_v63 }
 0x137   : > { %609 = vmatpush.xpose.msra.mxu2 %v586_v0  ;;  %629 = vmatpush.xpose.msra.mxu3 %v587_v1 }
 0x13b   : > { %610 = vmatpush.xpose.msra.mxu2 %v584_v2  ;;  %630 = vmatpush.xpose.msra.mxu3 %v585_v3 }
 0x13f   : > { %611 = vmatpush.xpose.msra.mxu2 %v582_v4  ;;  %631 = vmatpush.xpose.msra.mxu3 %v583_v5 }
 0x143   : > { %612 = vmatpush.xpose.msra.mxu2 %v580_v6  ;;  %632 = vmatpush.xpose.msra.mxu3 %v581_v7 }
 0x147   : > { %613 = vmatpush.xpose.msra.mxu2 %v578_v8  ;;  %633 = vmatpush.xpose.msra.mxu3 %v579_v9 }
 0x14b   : > { %614 = vmatpush.xpose.msra.mxu2 %v576_v10  ;;  %634 = vmatpush.xpose.msra.mxu3 %v577_v11 }
 0x14f   : > { %615 = vmatpush.xpose.msra.mxu2 %v574_v12  ;;  %635 = vmatpush.xpose.msra.mxu3 %v575_v13 }
 0x153   : > { %616 = vmatpush.xpose.msra.mxu2 %v572_v14  ;;  %636 = vmatpush.xpose.msra.mxu3 %v573_v15 }
 0x157   : > { %617 = vmatpush.xpose.msra.mxu2 %v570_v16  ;;  %637 = vmatpush.xpose.msra.mxu3 %v571_v17 }
 0x15a   : > { %618 = vmatmul.f32.vlgmr.msra.gmra.mxu2 %v1785_v18  ;;  %638 = vmatmul.f32.vlgmr.msra.gmra.mxu3 %v1785_v18 }
 0x15b   : > { %658 = vmatpush.msrb.mxu2 %v657_v22  ;;  %698 = vmatpush.msrb.mxu3 %v679_v24  ;;  %v654_v22 = vld [vmem:[%s2553_s2 + $0x60] sm:$0xff]  ;;  %v653_v24 = vld [vmem:[%s2553_s2 + $0x58] sm:$0xff] }
 0x15d   : > { %659 = vmatpush.msrb.mxu2 %v656_v20  ;;  %739 = vmatpush.msra.mxu3 %v600_v50  ;;  %v643_v50 = vld [vmem:[%s2553_s2 + $0x8] sm:$0xff] }
 0x15f   : > { %660 = vmatpush.msrb.mxu2 %v655_v26  ;;  %740 = vmatpush.msra.mxu3 %v598_v52  ;;  %v2250_v52 = vand.u32 127, %v338_v43 }
 0x161   : > { %661 = vmatpush.msrb.mxu2 %v654_v22  ;;  %741 = vmatpush.msra.mxu3 %v596_v54 }
 0x163   : > { %662 = vmatpush.msrb.mxu2 %v653_v24  ;;  %742 = vmatpush.msra.mxu3 %v594_v56 }
 0x165   : > { %663 = vmatpush.msrb.mxu2 %v652_v48  ;;  %743 = vmatpush.msra.mxu3 %v592_v58 }
 0x167   : > { %664 = vmatpush.msrb.mxu2 %v651_v46  ;;  %744 = vmatpush.msra.mxu3 %v590_v60 }
 0x169   : > { %665 = vmatpush.msrb.mxu2 %v650_v44  ;;  %745 = vmatpush.msra.mxu3 %v588_v62 }
 0x16b   : > { %666 = vmatpush.msrb.mxu2 %v649_v42  ;;  %746 = vmatpush.msra.mxu3 %v586_v0 }
 0x16d   : > { %667 = vmatpush.msrb.mxu2 %v648_v40  ;;  %747 = vmatpush.msra.mxu3 %v584_v2 }
 0x16f   : > { %668 = vmatpush.msrb.mxu2 %v647_v38  ;;  %748 = vmatpush.msra.mxu3 %v582_v4 }
 0x171   : > { %669 = vmatpush.msrb.mxu2 %v646_v36  ;;  %749 = vmatpush.msra.mxu3 %v580_v6  ;;  %v1055_v36 = vld [vmem:[#allocation2 + $0xf8] sm:$0xff] }
 0x173   : > { %670 = vmatpush.msrb.mxu2 %v645_v34  ;;  %750 = vmatpush.msra.mxu3 %v578_v8  ;;  %v1087_v34 = vld [vmem:[#allocation2 + $0x1f8] sm:$0xff] }
 0x175   : > { %671 = vmatpush.msrb.mxu2 %v644_v32  ;;  %751 = vmatpush.msra.mxu3 %v576_v10  ;;  %v1053_v32 = vld [vmem:[#allocation2 + $0xe8] sm:$0xff] }
 0x177   : > { %672 = vmatpush.msrb.mxu2 %v643_v50  ;;  %752 = vmatpush.msra.mxu3 %v574_v12  ;;  %v1085_v50 = vld [vmem:[#allocation2 + $0x1e8] sm:$0xff] }
 0x179   : > { %673 = vmatpush.msrb.mxu2 %v642_v30  ;;  %753 = vmatpush.msra.mxu3 %v572_v14  ;;  %v1051_v30 = vld [vmem:[#allocation2 + $0xd8] sm:$0xff] }
 0x17b   : > { %804 = vmatpush.msra.mxu2 %v601_v51  ;;  %754 = vmatpush.msra.mxu3 %v570_v16  ;;  %v2248_v51 = vshrl.u32 %v338_v43, 7  ;;  %v1077_v43 = vld [vmem:[#allocation2 + $0x1a8] sm:$0xff] }
 0x17d   : > { %805 = vmatpush.msra.mxu2 %v599_v53  ;;  %vm357_vm5 = vcmp.eq.s32.totalorder %v2248_v51, %v2250_v52  ;;  %v340_v58 = vadd.s32 8, %v2248_v51  ;;  %v342_v60 = vadd.s32 24, %v2248_v51  ;;  %v344_v62 = vadd.s32 40, %v2248_v51 }
 0x17e   : > { %v346_v0 = vadd.s32 56, %v2248_v51  ;;  %v348_v2 = vadd.s32 72, %v2248_v51  ;;  %v350_v4 = vadd.s32 88, %v2248_v51  ;;  %v352_v6 = vadd.s32 104, %v2248_v51 }
 0x17f   : > { %806 = vmatpush.msra.mxu2 %v597_v55  ;;  %vm358_vm6 = vcmp.eq.s32.totalorder %v340_v58, %v2250_v52  ;;  %vm360_vm8 = vcmp.eq.s32.totalorder %v342_v60, %v2250_v52  ;;  %vm362_vm10 = vcmp.eq.s32.totalorder %v344_v62, %v2250_v52  ;;  %v354_v8 = vadd.s32 120, %v2248_v51  ;;  %v1073_v58 = vld [vmem:[#allocation2 + $0x188] sm:$0xff] }
 0x180   : > { %vm364_vm12 = vcmp.eq.s32.totalorder %v346_v0, %v2250_v52  ;;  %vm366_vm14 = vcmp.eq.s32.totalorder %v348_v2, %v2250_v52  ;;  %v1071_v0 = vld [vmem:[#allocation2 + $0x178] sm:$0xff] }
 0x181   : > { %807 = vmatpush.msra.mxu2 %v595_v57 }
 0x183   : > { %808 = vmatpush.msra.mxu2 %v593_v59  ;;  %v341_v59 = vadd.s32 16, %v2248_v51 }
 0x185   : > { %809 = vmatpush.msra.mxu2 %v591_v61  ;;  %vm359_vm7 = vcmp.eq.s32.totalorder %v341_v59, %v2250_v52  ;;  %v343_v61 = vadd.s32 32, %v2248_v51 }
 0x187   : > { %810 = vmatpush.msra.mxu2 %v589_v63  ;;  %vm361_vm9 = vcmp.eq.s32.totalorder %v343_v61, %v2250_v52  ;;  %v345_v63 = vadd.s32 48, %v2248_v51 }
 0x189   : > { %811 = vmatpush.msra.mxu2 %v587_v1  ;;  %vm363_vm11 = vcmp.eq.s32.totalorder %v345_v63, %v2250_v52  ;;  %v347_v1 = vadd.s32 64, %v2248_v51  ;;  %v1039_v63 = vld [vmem:[#allocation2 + $0x78] sm:$0xff] }
 0x18b   : > { %812 = vmatpush.msra.mxu2 %v585_v3  ;;  %vm365_vm13 = vcmp.eq.s32.totalorder %v347_v1, %v2250_v52  ;;  %v349_v3 = vadd.s32 80, %v2248_v51 }
 0x18d   : > { %813 = vmatpush.msra.mxu2 %v583_v5  ;;  %vm367_vm15 = vcmp.eq.s32.totalorder %v349_v3, %v2250_v52  ;;  %v351_v5 = vadd.s32 96, %v2248_v51  ;;  %v1037_v3 = vld [vmem:[#allocation2 + $0x68] sm:$0xff] }
 0x18f   : > { %814 = vmatpush.msra.mxu2 %v581_v7  ;;  %v353_v7 = vadd.s32 112, %v2248_v51 }
 0x191   : > { %815 = vmatpush.msra.mxu2 %v579_v9 }
 0x193   : > { %816 = vmatpush.msra.mxu2 %v577_v11 }
 0x195   : > { %817 = vmatpush.msra.mxu2 %v575_v13 }
 0x197   : > { %818 = vmatpush.msra.mxu2 %v573_v15 }
 0x199   : > { %819 = vmatpush.msra.mxu2 %v571_v17 }
 0x1dd   : > { %v619_v28 = vpop.f32.mrf.mxu2  ;;  %v639_v31 = vpop.f32.mrf.mxu3 }
 0x1de   : > { %v640_v33 = vadd.f32 %v639_v31, %v619_v28  ;;  %v1083_v28 = vld [vmem:[#allocation2 + $0x1d8] sm:$0xff] }
 0x1e0   : > { %674 = vmatmul.f32.vlgmr.msrb.gmra.mxu2 %v640_v33 }
 0x1e1   : > { %1292 = vmatpush.msrb.mxu2 %v1087_v34  ;;  %v1067_v34 = vld [vmem:[#allocation2 + $0x158] sm:$0xff] }
 0x1e3   : > { %1293 = vmatpush.msrb.mxu2 %v1085_v50 }
 0x1e5   : > { %1294 = vmatpush.msrb.mxu2 %v1083_v28 }
 0x263   : > { %v675_v29 = vpop.f32.mrf.mxu2 }
 0x264   : > { %v678_v35 = vmax.f32 %v675_v29, 0.0  ;;  %v1049_v29 = vld [vmem:[#allocation2 + $0xc8] sm:$0xff] }
 0x266   : > { %1529 = vmatmul.msk.f32.vlgmr.msrb.gmra.mxu3 %vm391_vm0, %v678_v35  ;;  %vm368_vm0 = vcmp.eq.s32.totalorder %v350_v4, %v2250_v52  ;;  %v1081_v35 = vld [vmem:[#allocation2 + $0x1c8] sm:$0xff] }
 0x267   : > { %1272 = vmatpush.msrb.mxu3 %v1055_v36  ;;  %1295 = vmatpush.msrb.mxu2 %v1081_v35  ;;  %v1069_v4 = vld [vmem:[#allocation2 + $0x168] sm:$0xff]  ;;  %v1035_v36 = vld [vmem:[#allocation2 + $0x58] sm:$0xff] }
 0x269   : > { %1273 = vmatpush.msrb.mxu3 %v1053_v32 }
 0x26b   : > { %1274 = vmatpush.msrb.mxu3 %v1051_v30 }
 0x26d   : > { %1275 = vmatpush.msrb.mxu3 %v1049_v29 }
 0x2e9   : > { %v700_v27 = vpop.f32.mrf.mxu3 }
 0x2ea   : > { %v703_v25 = vsub.f32 0.0, %v700_v27 }
 0x2ec   : > { %v704_v37 = vmul.f32 1.442695, %v703_v25 }
 0x2ee   : > { %1635 = vpow2.f32 %v704_v37  ;;  %v1047_v37 = vld [vmem:[#allocation2 + $0xb8] sm:$0xff] }
 0x2ef   : > { %1276 = vmatpush.msrb.mxu3 %v1047_v37 }
 0x2f4   : > { %v1636_v23 = vpop.eup %1635 }
 0x2f5   : > { %v706_v39 = vadd.f32 1.0, %v1636_v23  ;;  %v1079_v23 = vld [vmem:[#allocation2 + $0x1b8] sm:$0xff] }
 0x2f6   : > { %1296 = vmatpush.msrb.mxu2 %v1079_v23 }
 0x2f7   : > { %1637 = vrcp.f32 %v706_v39  ;;  %v718_v45 = vand.u32 2147483648, %v706_v39  ;;  %v716_v49 = vand.u32 2147483647, %v706_v39  ;;  %vm712_vm2 = vweird.f32 %v706_v39 }
 0x2f8   : > { %1297 = vmatpush.msrb.mxu2 %v1077_v43  ;;  %v1063_v43 = vld [vmem:[#allocation2 + $0x138] sm:$0xff] }
 0x2f9   : > { %v719_v54 = vor.u32 1.1754944e-38, %v718_v45  ;;  %vm717_vm4 = vcmp.eq.f32.partialorder %v716_v49, 8.507059e+37  ;;  %v1075_v49 = vld [vmem:[#allocation2 + $0x198] sm:$0xff] }
 0x2fa   : > { %1298 = vmatpush.msrb.mxu2 %v1075_v49  ;;  %v1061_v49 = vld [vmem:[#allocation2 + $0x128] sm:$0xff] }
 0x2fc   : > { %1299 = vmatpush.msrb.mxu2 %v1073_v58  ;;  %v1059_v58 = vld [vmem:[#allocation2 + $0x118] sm:$0xff] }
 0x2fd   : > { %v1638_v21 = vpop.eup %1637 }
 0x2fe   : > { %v708_v41 = vmul.f32 %v1638_v21, %v706_v39  ;;  %vm713_vm1 = vweird.f32 %v1638_v21  ;;  %v1045_v39 = vld [vmem:[#allocation2 + $0xa8] sm:$0xff]  ;;  %1300 = vmatpush.msrb.mxu2 %v1071_v0 }
 0x2ff   : > { %vm714_vm3 = vmor %vm712_vm2, %vm713_vm1  ;;  %vm369_vm1 = vcmp.eq.s32.totalorder %v351_v5, %v2250_v52  ;;  %vm370_vm2 = vcmp.eq.s32.totalorder %v352_v6, %v2250_v52  ;;  %1277 = vmatpush.msrb.mxu3 %v1045_v39 }
 0x300   : > { %v709_v19 = vsub.f32 1.0, %v708_v41  ;;  %1301 = vmatpush.msrb.mxu2 %v1069_v4 }
 0x302   : > { %v710_v47 = vmul.f32 %v1638_v21, %v709_v19  ;;  %v1043_v19 = vld [vmem:[#allocation2 + $0x98] sm:$0xff]  ;;  %1302 = vmatpush.msrb.mxu2 %v1067_v34 }
 0x303   : > { %1278 = vmatpush.msrb.mxu3 %v1043_v19 }
 0x304   : > { %v711_v53 = vadd.f32 %v1638_v21, %v710_v47 }
 0x306   : > { %v715_v55 = vsel %vm714_vm3, %v1638_v21, %v711_v53  ;;  %vm371_vm3 = vcmp.eq.s32.totalorder %v353_v7, %v2250_v52 }
 0x307   : > { %v720_v56 = vsel %vm717_vm4, %v719_v54, %v715_v55  ;;  %vm372_vm4 = vcmp.eq.s32.totalorder %v354_v8, %v2250_v52 }
 0x308   : > { %v722_v57 = vperm.slane %v720_v56, 0 }
 0x30a   : > { %1530 = vmatmul.msk.f32.vlgmr.msra.gmra.mxu3 %vm357_vm5, %v722_v57  ;;  %1546 = vmatmul.msk.f32.vlgmr.msra.gmra.mxu2 %vm357_vm5, %v722_v57 }
 0x312   : > { %1531 = vmatmul.msk.f32.gmra.mxu3 %vm358_vm6, %v722_v57  ;;  %1547 = vmatmul.msk.f32.gmra.mxu2 %vm358_vm6, %v722_v57 }
 0x31a   : > { %1532 = vmatmul.msk.f32.gmra.mxu3 %vm359_vm7, %v722_v57  ;;  %1548 = vmatmul.msk.f32.gmra.mxu2 %vm359_vm7, %v722_v57 }
 0x322   : > { %1533 = vmatmul.msk.f32.gmra.mxu3 %vm360_vm8, %v722_v57  ;;  %1549 = vmatmul.msk.f32.gmra.mxu2 %vm360_vm8, %v722_v57 }
 0x32a   : > { %1534 = vmatmul.msk.f32.gmra.mxu3 %vm361_vm9, %v722_v57  ;;  %1550 = vmatmul.msk.f32.gmra.mxu2 %vm361_vm9, %v722_v57 }
 0x332   : > { %1535 = vmatmul.msk.f32.gmra.mxu3 %vm362_vm10, %v722_v57  ;;  %1551 = vmatmul.msk.f32.gmra.mxu2 %vm362_vm10, %v722_v57 }
 0x33a   : > { %1536 = vmatmul.msk.f32.gmra.mxu3 %vm363_vm11, %v722_v57  ;;  %1552 = vmatmul.msk.f32.gmra.mxu2 %vm363_vm11, %v722_v57 }
 0x342   : > { %1537 = vmatmul.msk.f32.gmra.mxu3 %vm364_vm12, %v722_v57  ;;  %1553 = vmatmul.msk.f32.gmra.mxu2 %vm364_vm12, %v722_v57 }
 0x34a   : > { %1538 = vmatmul.msk.f32.gmra.mxu3 %vm365_vm13, %v722_v57  ;;  %1554 = vmatmul.msk.f32.gmra.mxu2 %vm365_vm13, %v722_v57 }
 0x352   : > { %1539 = vmatmul.msk.f32.gmra.mxu3 %vm366_vm14, %v722_v57  ;;  %1555 = vmatmul.msk.f32.gmra.mxu2 %vm366_vm14, %v722_v57 }
 0x35a   : > { %1540 = vmatmul.msk.f32.gmra.mxu3 %vm367_vm15, %v722_v57  ;;  %1556 = vmatmul.msk.f32.gmra.mxu2 %vm367_vm15, %v722_v57 }
 0x362   : > { %1541 = vmatmul.msk.f32.gmra.mxu3 %vm368_vm0, %v722_v57  ;;  %1557 = vmatmul.msk.f32.gmra.mxu2 %vm368_vm0, %v722_v57 }
 0x36a   : > { %1542 = vmatmul.msk.f32.gmra.mxu3 %vm369_vm1, %v722_v57  ;;  %1558 = vmatmul.msk.f32.gmra.mxu2 %vm369_vm1, %v722_v57 }
 0x372   : > { %1543 = vmatmul.msk.f32.gmra.mxu3 %vm370_vm2, %v722_v57  ;;  %1559 = vmatmul.msk.f32.gmra.mxu2 %vm370_vm2, %v722_v57 }
 0x37a   : > { %1544 = vmatmul.msk.f32.gmra.mxu3 %vm371_vm3, %v722_v57  ;;  %1560 = vmatmul.msk.f32.gmra.mxu2 %vm371_vm3, %v722_v57 }
 0x382   : > { %1545 = vmatmul.msk.f32.gmra.mxu3 %vm372_vm4, %v722_v57  ;;  %1561 = vmatmul.msk.f32.gmra.mxu2 %vm372_vm4, %v722_v57  ;;  %v1041_v57 = vld [vmem:[#allocation2 + $0x88] sm:$0xff] }
 0x383   : > { %1279 = vmatpush.msrb.mxu3 %v1041_v57  ;;  %v1027_v57 = vld [vmem:[#allocation2 + $0x18] sm:$0xff] }
 0x385   : > { %1280 = vmatpush.msrb.mxu3 %v1039_v63 }
 0x387   : > { %1281 = vmatpush.msrb.mxu3 %v1037_v3 }
 0x389   : > { %1282 = vmatpush.msrb.mxu3 %v1035_v36 }
 0x38d   : > { %v2284_v9 = vpop.f32.mrf.mxu3  ;;  %v2286_v10 = vpop.f32.mrf.mxu2 }
 0x395   : > { %v2288_v11 = vpop.f32.mrf.mxu3  ;;  %v2290_v12 = vpop.f32.mrf.mxu2 }
 0x396   : > { %v869_v5 = vadd.f32 %v2288_v11, %v2284_v9  ;;  %v890_v6 = vadd.f32 %v2290_v12, %v2286_v10 }
 0x39d   : > { %v2292_v13 = vpop.f32.mrf.mxu3  ;;  %v2294_v14 = vpop.f32.mrf.mxu2 }
 0x39e   : > { %v920_v51 = vmax.f32 %v2284_v9, %v2292_v13  ;;  %v941_v52 = vmax.f32 %v2286_v10, %v2294_v14  ;;  %v870_v32 = vadd.f32 %v869_v5, %v2292_v13  ;;  %v891_v50 = vadd.f32 %v890_v6, %v2294_v14 }
 0x3a5   : > { %v2296_v15 = vpop.f32.mrf.mxu3  ;;  %v2298_v16 = vpop.f32.mrf.mxu2 }
 0x3a6   : > { %v921_v27 = vmax.f32 %v2288_v11, %v2296_v15  ;;  %v942_v25 = vmax.f32 %v2290_v12, %v2298_v16  ;;  %v871_v37 = vadd.f32 %v870_v32, %v2296_v15  ;;  %v892_v23 = vadd.f32 %v891_v50, %v2298_v16 }
 0x3ad   : > { %v2300_v17 = vpop.f32.mrf.mxu3  ;;  %v2302_v20 = vpop.f32.mrf.mxu2 }
 0x3ae   : > { %v922_v59 = vmax.f32 %v920_v51, %v2300_v17  ;;  %v943_v60 = vmax.f32 %v941_v52, %v2302_v20  ;;  %v872_v19 = vadd.f32 %v871_v37, %v2300_v17 }
 0x3b5   : > { %v2304_v18 = vpop.f32.mrf.mxu3  ;;  %v2306_v26 = vpop.f32.mrf.mxu2 }
 0x3b6   : > { %v923_v21 = vmax.f32 %v921_v27, %v2304_v18  ;;  %v944_v41 = vmax.f32 %v942_v25, %v2306_v26  ;;  %v1033_v27 = vld [vmem:[#allocation2 + $0x48] sm:$0xff]  ;;  %v873_v51 = vadd.f32 %v872_v19, %v2304_v18 }
 0x3b7   : > { %v1065_v25 = vld [vmem:[#allocation2 + $0x148] sm:$0xff]  ;;  %1283 = vmatpush.msrb.mxu3 %v1033_v27 }
 0x3b8   : > { %1303 = vmatpush.msrb.mxu2 %v1065_v25 }
 0x3ba   : > { %1304 = vmatpush.msrb.mxu2 %v1063_v43 }
 0x3bc   : > { %1305 = vmatpush.msrb.mxu2 %v1061_v49 }
 0x3bd   : > { %v2308_v22 = vpop.f32.mrf.mxu3  ;;  %v2310_v24 = vpop.f32.mrf.mxu2 }
 0x3be   : > { %v924_v1 = vmax.f32 %v922_v59, %v2308_v22  ;;  %v945_v2 = vmax.f32 %v943_v60, %v2310_v24  ;;  %v874_v59 = vadd.f32 %v873_v51, %v2308_v22  ;;  %1306 = vmatpush.msrb.mxu2 %v1059_v58 }
 0x3c5   : > { %v2312_v48 = vpop.f32.mrf.mxu3  ;;  %v2314_v46 = vpop.f32.mrf.mxu2 }
 0x3c6   : > { %v925_v45 = vmax.f32 %v923_v21, %v2312_v48  ;;  %v946_v47 = vmax.f32 %v944_v41, %v2314_v46  ;;  %v1031_v41 = vld [vmem:[#allocation2 + $0x38] sm:$0xff]  ;;  %v875_v3 = vadd.f32 %v874_v59, %v2312_v48 }
 0x3c7   : > { %1284 = vmatpush.msrb.mxu3 %v1031_v41 }
 0x3cd   : > { %v2316_v44 = vpop.f32.mrf.mxu3  ;;  %v2318_v42 = vpop.f32.mrf.mxu2 }
 0x3ce   : > { %v926_v7 = vmax.f32 %v924_v1, %v2316_v44  ;;  %v947_v8 = vmax.f32 %v945_v2, %v2318_v42  ;;  %v1025_v1 = vld [vmem:[#allocation2 + $0x8] sm:$0xff]  ;;  %v876_v5 = vadd.f32 %v875_v3, %v2316_v44 }
 0x3cf   : > { %v1057_v2 = vld [vmem:[#allocation2 + $0x108] sm:$0xff] }
 0x3d0   : > { %1307 = vmatpush.msrb.mxu2 %v1057_v2 }
 0x3d5   : > { %v2320_v40 = vpop.f32.mrf.mxu3  ;;  %v2322_v38 = vpop.f32.mrf.mxu2 }
 0x3d6   : > { %v2341_v53 = vmax.f32 %v925_v45, %v2320_v40  ;;  %v2344_v54 = vmax.f32 %v946_v47, %v2322_v38  ;;  %v893_v45 = vadd.f32 %v892_v23, %v2302_v20  ;;  %v1029_v47 = vld [vmem:[#allocation2 + $0x28] sm:$0xff] }
 0x3d7   : > { %1285 = vmatpush.msrb.mxu3 %v1029_v47 }
 0x3d8   : > { %v894_v52 = vadd.f32 %v893_v45, %v2306_v26 }
 0x3d9   : > { %1286 = vmatpush.msrb.mxu3 %v1027_v57 }
 0x3da   : > { %v895_v60 = vadd.f32 %v894_v52, %v2310_v24 }
 0x3db   : > { %1287 = vmatpush.msrb.mxu3 %v1025_v1 }
 0x3dc   : > { %v896_v4 = vadd.f32 %v895_v60, %v2314_v46 }
 0x3dd   : > { %v2324_v31 = vpop.f32.mrf.mxu3  ;;  %v2326_v33 = vpop.f32.mrf.mxu2 }
 0x3de   : > { %v928_v30 = vmax.f32 %v926_v7, %v2324_v31  ;;  %v949_v28 = vmax.f32 %v947_v8, %v2326_v33  ;;  %v897_v6 = vadd.f32 %v896_v4, %v2318_v42  ;;  %v1786_v7 = vmov 128.0  }
 0x3df   : > { %1639 = vrcp.f32 %v1786_v7  ;;  %v877_v8 = vadd.f32 %v876_v5, %v2320_v40 }
 0x3e0   : > { %v898_v36 = vadd.f32 %v897_v6, %v2322_v38 }
 0x3e1   : > { %v878_v34 = vadd.f32 %v877_v8, %v2324_v31 }
 0x3e2   : > { %v899_v32 = vadd.f32 %v898_v36, %v2326_v33 }
 0x3e5   : > { %v2346_v55 = vpop.f32.mrf.mxu3  ;;  %v2348_v56 = vpop.f32.mrf.mxu2 }
 0x3e6   : > { %v929_v61 = vmax.f32 %v2341_v53, %v2346_v55  ;;  %v950_v62 = vmax.f32 %v2344_v54, %v2348_v56  ;;  %v879_v27 = vadd.f32 %v878_v34, %v2346_v55  ;;  %v900_v25 = vadd.f32 %v899_v32, %v2348_v56 }
 0x3ed   : > { %v2368_v29 = vpop.f32.mrf.mxu3  ;;  %v2370_v35 = vpop.f32.mrf.mxu2 }
 0x3ee   : > { %v2375_v39 = vmax.f32 %v928_v30, %v2368_v29  ;;  %v2378_v21 = vmax.f32 %v949_v28, %v2370_v35  ;;  %v1640_v28 = vpop.eup %1639  ;;  %v880_v37 = vadd.f32 %v879_v27, %v2368_v29  ;;  %v901_v23 = vadd.f32 %v900_v25, %v2370_v35  ;;  %v1100_v27 = vld [vmem:[#allocation5 + $0x60] sm:$0xff] }
 0x3ef   : > { %v912_v41 = vmul.f32 128.0, %v1640_v28  ;;  %vm916_vm5 = vweird.f32 %v1640_v28  ;;  %v1132_v25 = vld [vmem:[#allocation5 + $0x160] sm:$0xff] }
 0x3f1   : > { %v913_v60 = vsub.f32 1.0, %v912_v41  ;;  %v1130_v41 = vld [vmem:[#allocation5 + $0x150] sm:$0xff] }
 0x3f5   : > { %v795_v63 = vpop.f32.mrf.mxu3  ;;  %v860_v0 = vpop.f32.mrf.mxu2 }
 0x3f6   : > { %v881_v43 = vadd.f32 %v880_v37, %v795_v63  ;;  %v902_v19 = vadd.f32 %v901_v23, %v860_v0  ;;  %v931_v45 = vmax.f32 %v929_v61, %v795_v63  ;;  %v952_v47 = vmax.f32 %v950_v62, %v860_v0  ;;  %v1098_v37 = vld [vmem:[#allocation5 + $0x50] sm:$0xff] }
 0x3fd   : > { %v798_v50 = vpop.f32.mrf.mxu3  ;;  %v863_v30 = vpop.f32.mrf.mxu2 }
 0x3fe   : > { %v882_v49 = vadd.f32 %v881_v43, %v798_v50  ;;  %v903_v51 = vadd.f32 %v902_v19, %v863_v30  ;;  %v932_v52 = vmax.f32 %v2375_v39, %v798_v50  ;;  %v953_v57 = vmax.f32 %v2378_v21, %v863_v30  ;;  %v1096_v19 = vld [vmem:[#allocation5 + $0x40] sm:$0xff] }
 0x3ff   : > { %v914_v39 = vmul.f32 %v1640_v28, %v913_v60  ;;  %v1090_v60 = vld [vmem:[#allocation5 + $0x10] sm:$0xff] }
 0x401   : > { %v915_v8 = vadd.f32 %v1640_v28, %v914_v39  ;;  %v1117_v39 = vld [vmem:[#allocation5 + $0xe8] sm:$0xff] }
 0x405   : > { %v801_v58 = vpop.f32.mrf.mxu3  ;;  %v866_v59 = vpop.f32.mrf.mxu2 }
 0x406   : > { %v883_v1 = vadd.f32 %v882_v49, %v801_v58  ;;  %v933_v2 = vmax.f32 %v931_v45, %v801_v58  ;;  %v904_v3 = vadd.f32 %v903_v51, %v866_v59  ;;  %v954_v4 = vmax.f32 %v952_v47, %v866_v59  ;;  %966 = vmatpush.msrb.mxu0 %v801_v58  ;;  %v1128_v45 = vld [vmem:[#allocation5 + $0x140] sm:$0xff]  ;;  %v965_v47 = vld [vmem:[%s2557_s6 + $0x18] sm:$0xff]  ;;  %v1094_v49 = vld [vmem:[#allocation5 + $0x30] sm:$0xff] }
 0x407   : > { %995 = vmatpush.msrb.mxu1 %v866_v59  ;;  %v1126_v51 = vld [vmem:[#allocation5 + $0x130] sm:$0xff]  ;;  %v1124_v59 = vld [vmem:[#allocation5 + $0x120] sm:$0xff] }
 0x408   : > { %v884_v53 = vrot.slane %v883_v1, 4  ;;  %v2406_v61 = vmax.f32 %v932_v52, %v933_v2  ;;  %v905_v54 = vrot.slane %v904_v3, 4  ;;  %v2408_v62 = vmax.f32 %v953_v57, %v954_v4  ;;  %967 = vmatpush.msrb.mxu0 %v798_v50  ;;  %v1092_v57 = vld [vmem:[#allocation5 + $0x20] sm:$0xff] }
 0x409   : > { %996 = vmatpush.msrb.mxu1 %v863_v30  ;;  %v1134_v30 = vld [vmem:[#allocation5 + $0x170] sm:$0xff] }
 0x40a   : > { %v885_v5 = vadd.f32 %v884_v53, %v883_v1  ;;  %v906_v21 = vadd.f32 %v905_v54, %v904_v3  ;;  %968 = vmatpush.msrb.mxu0 %v795_v63  ;;  %v917_v63 = vsel %vm916_vm5, %v1640_v28, %v915_v8  ;;  %v1122_v1 = vld [vmem:[#allocation5 + $0x110] sm:$0xff]  ;;  %v1088_v3 = vld [vmem:[#allocation5] sm:$0xff]  ;;  %v1151_v54 = vld [vmem:[#allocation5 + $0x1f8] sm:$0xff] }
 0x40b   : > { %997 = vmatpush.msrb.mxu1 %v860_v0  ;;  %v1120_v53 = vld [vmem:[#allocation5 + $0x100] sm:$0xff]  ;;  %v1113_v8 = vld [vmem:[#allocation5 + $0xc8] sm:$0xff] }
 0x40c   : > { %v886_v6 = vrot.slane %v885_v5, 2  ;;  %v907_v7 = vrot.slane %v906_v21, 2  ;;  %969 = vmatpush.msrb.mxu0 %v2368_v29 }
 0x40d   : > { %998 = vmatpush.msrb.mxu1 %v2370_v35 }
 0x40e   : > { %v887_v36 = vadd.f32 %v886_v6, %v885_v5  ;;  %v908_v34 = vadd.f32 %v907_v7, %v906_v21  ;;  %970 = vmatpush.msrb.mxu0 %v2346_v55  ;;  %v1149_v21 = vld [vmem:[#allocation5 + $0x1e8] sm:$0xff]  ;;  %v1115_v6 = vld [vmem:[#allocation5 + $0xd8] sm:$0xff] }
 0x40f   : > { %999 = vmatpush.msrb.mxu1 %v2348_v56  ;;  %v1147_v7 = vld [vmem:[#allocation5 + $0x1d8] sm:$0xff] }
 0x410   : > { %v888_v32 = vrot.slane %v887_v36, 1  ;;  %v909_v50 = vrot.slane %v908_v34, 1  ;;  %971 = vmatpush.msrb.mxu0 %v2324_v31  ;;  %v964_v31 = vld [vmem:[%s2557_s6 + $0x10] sm:$0xff] }
 0x411   : > { %1000 = vmatpush.msrb.mxu1 %v2326_v33  ;;  %v1102_v33 = vld [vmem:[#allocation5 + $0x70] sm:$0xff] }
 0x412   : > { %972 = vmatpush.msrb.mxu0 %v2320_v40  ;;  %v889_v29 = vadd.f32 %v888_v32, %v887_v36  ;;  %v910_v0 = vadd.f32 %v909_v50, %v908_v34  ;;  %v1104_v40 = vld [vmem:[#allocation5 + $0x80] sm:$0xff]  ;;  %v1145_v36 = vld [vmem:[#allocation5 + $0x1c8] sm:$0xff]  ;;  %v1111_v34 = vld [vmem:[#allocation5 + $0xb8] sm:$0xff] }
 0x413   : > { %1001 = vmatpush.msrb.mxu1 %v2322_v38  ;;  %v1136_v38 = vld [vmem:[#allocation5 + $0x180] sm:$0xff]  ;;  %v1143_v32 = vld [vmem:[#allocation5 + $0x1b8] sm:$0xff]  ;;  %v1109_v50 = vld [vmem:[#allocation5 + $0xa8] sm:$0xff] }
 0x414   : > { %973 = vmatpush.msrb.mxu0 %v2316_v44  ;;  %v2419_v35 = vmul.f32 %v917_v63, %v889_v29  ;;  %v2421_v55 = vmul.f32 %v917_v63, %v910_v0  ;;  %v1138_v44 = vld [vmem:[#allocation5 + $0x190] sm:$0xff]  ;;  %v1141_v63 = vld [vmem:[#allocation5 + $0x1a8] sm:$0xff]  ;;  %v1107_v29 = vld [vmem:[#allocation5 + $0x98] sm:$0xff] }
 0x415   : > { %1002 = vmatpush.msrb.mxu1 %v2318_v42  ;;  %v956_v42 = vrot.slane %v2408_v62, 4  ;;  %v1139_v0 = vld [vmem:[#allocation5 + $0x198] sm:$0xff] }
 0x416   : > { %974 = vmatpush.msrb.mxu0 %v2312_v48  ;;  %1288 = vmatmul.f32.vlgmr.msrb.gmra.mxu3 %v2419_v35  ;;  %v1106_v48 = vld [vmem:[#allocation5 + $0x90] sm:$0xff] }
 0x417   : > { %1003 = vmatpush.msrb.mxu1 %v2314_v46  ;;  %1308 = vmatmul.f32.vlgmr.msrb.gmra.mxu2 %v2421_v55  ;;  %v935_v46 = vrot.slane %v2406_v61, 4  ;;  %v957_v28 = vmax.f32 %v2408_v62, %v956_v42  ;;  %v1121_v42 = vld [vmem:[#allocation5 + $0x108] sm:$0xff] }
 0x418   : > { %975 = vmatpush.msrb.mxu0 %v2308_v22  ;;  %v1108_v22 = vld [vmem:[#allocation5 + $0xa0] sm:$0xff] }
 0x419   : > { %1004 = vmatpush.msrb.mxu1 %v2310_v24  ;;  %v1140_v24 = vld [vmem:[#allocation5 + $0x1a0] sm:$0xff]  ;;  %v936_v56 = vmax.f32 %v2406_v61, %v935_v46  ;;  %v958_v43 = vrot.slane %v957_v28, 2  ;;  %v1119_v61 = vld [vmem:[#allocation5 + $0xf8] sm:$0xff] }
 0x41a   : > { %976 = vmatpush.msrb.mxu0 %v2304_v18  ;;  %v962_v18 = vld [vmem:[%s2557_s6] sm:$0xff]  ;;  %v1123_v46 = vld [vmem:[#allocation5 + $0x118] sm:$0xff] }
 0x41b   : > { %1005 = vmatpush.msrb.mxu1 %v2306_v26  ;;  %v1118_v26 = vld [vmem:[#allocation5 + $0xf0] sm:$0xff]  ;;  %v937_v23 = vrot.slane %v936_v56, 2  ;;  %v959_v58 = vmax.f32 %v957_v28, %v958_v43  ;;  %v1048_v28 = vld [vmem:[#allocation2 + $0xc0] sm:$0xff] }
 0x41c   : > { %977 = vmatpush.msrb.mxu0 %v2300_v17  ;;  %v1150_v17 = vld [vmem:[#allocation5 + $0x1f0] sm:$0xff] }
 0x41d   : > { %1006 = vmatpush.msrb.mxu1 %v2302_v20  ;;  %v1144_v20 = vld [vmem:[#allocation5 + $0x1c0] sm:$0xff]  ;;  %v938_v52 = vmax.f32 %v936_v56, %v937_v23  ;;  %v960_v4 = vrot.slane %v959_v58, 1  ;;  %v1050_v56 = vld [vmem:[#allocation2 + $0xd0] sm:$0xff] }
 0x41e   : > { %978 = vmatpush.msrb.mxu0 %v2296_v15  ;;  %v1116_v15 = vld [vmem:[#allocation5 + $0xe0] sm:$0xff]  ;;  %v1042_v43 = vld [vmem:[#allocation2 + $0x90] sm:$0xff] }
 0x41f   : > { %1007 = vmatpush.msrb.mxu1 %v2298_v16  ;;  %v1112_v16 = vld [vmem:[#allocation5 + $0xc0] sm:$0xff]  ;;  %v939_v2 = vrot.slane %v938_v52, 1  ;;  %v2460_v5 = vmax.f32 %v959_v58, %v960_v4  ;;  %v1034_v58 = vld [vmem:[#allocation2 + $0x50] sm:$0xff] }
 0x420   : > { %979 = vmatpush.msrb.mxu0 %v2292_v13  ;;  %v1148_v13 = vld [vmem:[#allocation5 + $0x1e0] sm:$0xff] }
 0x421   : > { %1008 = vmatpush.msrb.mxu1 %v2294_v14  ;;  %v1114_v14 = vld [vmem:[#allocation5 + $0xd0] sm:$0xff]  ;;  %v2458_v62 = vmax.f32 %v938_v52, %v939_v2  ;;  %v1044_v23 = vld [vmem:[#allocation2 + $0xa0] sm:$0xff] }
 0x422   : > { %980 = vmatpush.msrb.mxu0 %v2288_v11  ;;  %v1146_v11 = vld [vmem:[#allocation5 + $0x1d0] sm:$0xff]  ;;  %v1036_v52 = vld [vmem:[#allocation2 + $0x60] sm:$0xff] }
 0x423   : > { %1009 = vmatpush.msrb.mxu1 %v2290_v12  ;;  %v1110_v12 = vld [vmem:[#allocation5 + $0xb0] sm:$0xff]  ;;  %v1028_v4 = vld [vmem:[#allocation2 + $0x20] sm:$0xff] }
 0x424   : > { %981 = vmatpush.msrb.mxu0 %v2284_v9  ;;  %v963_v9 = vld [vmem:[%s2557_s6 + $0x8] sm:$0xff]  ;;  %v1030_v2 = vld [vmem:[#allocation2 + $0x30] sm:$0xff] }
 0x425   : > { %1010 = vmatpush.msrb.mxu1 %v2286_v10  ;;  %982 = vmatmul.f32.vlgmr.msrb.gmra.mxu0 %v962_v18  ;;  %v1142_v10 = vld [vmem:[#allocation5 + $0x1b0] sm:$0xff] }
 0x426   : > { %1011 = vmatmul.f32.vlgmr.msrb.gmra.mxu1 %v962_v18  ;;  %1152 = vmatpush.msra.mxu0 %v1118_v26  ;;  %v1105_v18 = vld [vmem:[#allocation5 + $0x88] sm:$0xff] }
 0x427   : > { %1172 = vmatpush.msra.mxu1 %v1150_v17  ;;  %v1137_v26 = vld [vmem:[#allocation5 + $0x188] sm:$0xff]  ;;  %v1103_v17 = vld [vmem:[#allocation5 + $0x78] sm:$0xff] }
 0x428   : > { %1153 = vmatpush.msra.mxu0 %v1116_v15  ;;  %v1135_v15 = vld [vmem:[#allocation5 + $0x178] sm:$0xff] }
 0x429   : > { %1173 = vmatpush.msra.mxu1 %v1148_v13  ;;  %v1101_v13 = vld [vmem:[#allocation5 + $0x68] sm:$0xff] }
 0x42a   : > { %1154 = vmatpush.msra.mxu0 %v1114_v14  ;;  %v1133_v14 = vld [vmem:[#allocation5 + $0x168] sm:$0xff] }
 0x42b   : > { %1174 = vmatpush.msra.mxu1 %v1146_v11  ;;  %v1099_v11 = vld [vmem:[#allocation5 + $0x58] sm:$0xff] }
 0x42c   : > { %1155 = vmatpush.msra.mxu0 %v1112_v16  ;;  %v1131_v16 = vld [vmem:[#allocation5 + $0x158] sm:$0xff] }
 0x42d   : > { %1175 = vmatpush.msra.mxu1 %v1144_v20  ;;  %985 = vmatmul.f32.gmra.mxu0 %v963_v9  ;;  %v1097_v20 = vld [vmem:[#allocation5 + $0x48] sm:$0xff] }
 0x42e   : > { %1014 = vmatmul.f32.gmra.mxu1 %v963_v9  ;;  %1156 = vmatpush.msra.mxu0 %v1110_v12  ;;  %v1129_v9 = vld [vmem:[#allocation5 + $0x148] sm:$0xff]  ;;  %v1095_v12 = vld [vmem:[#allocation5 + $0x38] sm:$0xff] }
 0x42f   : > { %1176 = vmatpush.msra.mxu1 %v1142_v10  ;;  %v1127_v10 = vld [vmem:[#allocation5 + $0x138] sm:$0xff] }
 0x430   : > { %1157 = vmatpush.msra.mxu0 %v1108_v22  ;;  %v1093_v22 = vld [vmem:[#allocation5 + $0x28] sm:$0xff] }
 0x431   : > { %1177 = vmatpush.msra.mxu1 %v1140_v24  ;;  %v1125_v24 = vld [vmem:[#allocation5 + $0x128] sm:$0xff] }
 0x432   : > { %1158 = vmatpush.msra.mxu0 %v1106_v48  ;;  %v1091_v48 = vld [vmem:[#allocation5 + $0x18] sm:$0xff] }
 0x433   : > { %1178 = vmatpush.msra.mxu1 %v1138_v44  ;;  %v1089_v44 = vld [vmem:[#allocation5 + $0x8] sm:$0xff] }
 0x434   : > { %1159 = vmatpush.msra.mxu0 %v1104_v40  ;;  %v1054_v40 = vld [vmem:[#allocation2 + $0xf0] sm:$0xff] }
 0x435   : > { %1179 = vmatpush.msra.mxu1 %v1136_v38  ;;  %988 = vmatmul.f32.gmra.mxu0 %v964_v31  ;;  %v1086_v38 = vld [vmem:[#allocation2 + $0x1f0] sm:$0xff] }
 0x436   : > { %1017 = vmatmul.f32.gmra.mxu1 %v964_v31  ;;  %1160 = vmatpush.msra.mxu0 %v1102_v33  ;;  %v1052_v31 = vld [vmem:[#allocation2 + $0xe0] sm:$0xff] }
 0x437   : > { %1180 = vmatpush.msra.mxu1 %v1134_v30  ;;  %v1084_v33 = vld [vmem:[#allocation2 + $0x1e0] sm:$0xff]  ;;  %v1082_v30 = vld [vmem:[#allocation2 + $0x1d0] sm:$0xff] }
 0x438   : > { %1161 = vmatpush.msra.mxu0 %v1100_v27  ;;  %v1080_v27 = vld [vmem:[#allocation2 + $0x1c0] sm:$0xff] }
 0x439   : > { %1181 = vmatpush.msra.mxu1 %v1132_v25  ;;  %v1046_v25 = vld [vmem:[#allocation2 + $0xb0] sm:$0xff] }
 0x43a   : > { %1162 = vmatpush.msra.mxu0 %v1098_v37  ;;  %v1078_v37 = vld [vmem:[#allocation2 + $0x1b0] sm:$0xff] }
 0x43b   : > { %1182 = vmatpush.msra.mxu1 %v1130_v41  ;;  %v1076_v41 = vld [vmem:[#allocation2 + $0x1a0] sm:$0xff] }
 0x43c   : > { %1163 = vmatpush.msra.mxu0 %v1096_v19  ;;  %v1074_v19 = vld [vmem:[#allocation2 + $0x190] sm:$0xff] }
 0x43d   : > { %1183 = vmatpush.msra.mxu1 %v1128_v45  ;;  %991 = vmatmul.f32.gmra.mxu0 %v965_v47  ;;  %v1040_v45 = vld [vmem:[#allocation2 + $0x80] sm:$0xff] }
 0x43e   : > { %1020 = vmatmul.f32.gmra.mxu1 %v965_v47  ;;  %1164 = vmatpush.msra.mxu0 %v1094_v49  ;;  %v1072_v47 = vld [vmem:[#allocation2 + $0x180] sm:$0xff]  ;;  %v1038_v49 = vld [vmem:[#allocation2 + $0x70] sm:$0xff] }
 0x43f   : > { %1184 = vmatpush.msra.mxu1 %v1126_v51  ;;  %v1070_v51 = vld [vmem:[#allocation2 + $0x170] sm:$0xff] }
 0x440   : > { %1165 = vmatpush.msra.mxu0 %v1092_v57  ;;  %v1068_v57 = vld [vmem:[#allocation2 + $0x160] sm:$0xff] }
 0x441   : > { %1185 = vmatpush.msra.mxu1 %v1124_v59  ;;  %v1066_v59 = vld [vmem:[#allocation2 + $0x150] sm:$0xff] }
 0x442   : > { %1166 = vmatpush.msra.mxu0 %v1090_v60  ;;  %v1032_v60 = vld [vmem:[#allocation2 + $0x40] sm:$0xff] }
 0x443   : > { %1186 = vmatpush.msra.mxu1 %v1122_v1  ;;  %v1064_v1 = vld [vmem:[#allocation2 + $0x140] sm:$0xff] }
 0x444   : > { %1167 = vmatpush.msra.mxu0 %v1088_v3  ;;  %v1062_v3 = vld [vmem:[#allocation2 + $0x130] sm:$0xff] }
 0x445   : > { %1187 = vmatpush.msra.mxu1 %v1120_v53  ;;  %1168 = vmatmul.f32.vlgmr.msra.gmra.mxu0 %v2458_v62  ;;  %v1060_v53 = vld [vmem:[#allocation2 + $0x120] sm:$0xff] }
 0x446   : > { %1192 = vmatpush.msrb.mxu0 %v1119_v61  ;;  %1188 = vmatmul.f32.vlgmr.msra.gmra.mxu1 %v2460_v5  ;;  %v1026_v61 = vld [vmem:[#allocation2 + $0x10] sm:$0xff] }
 0x447   : > { %1212 = vmatpush.msrb.mxu1 %v1151_v54  ;;  %v1058_v54 = vld [vmem:[#allocation2 + $0x110] sm:$0xff] }
 0x448   : > { %1193 = vmatpush.msrb.mxu0 %v1117_v39  ;;  %v1056_v39 = vld [vmem:[#allocation2 + $0x100] sm:$0xff] }
 0x449   : > { %1213 = vmatpush.msrb.mxu1 %v1149_v21 }
 0x44a   : > { %1194 = vmatpush.msrb.mxu0 %v1115_v6 }
 0x44b   : > { %1214 = vmatpush.msrb.mxu1 %v1147_v7 }
 0x44c   : > { %1195 = vmatpush.msrb.mxu0 %v1113_v8 }
 0x44d   : > { %1215 = vmatpush.msrb.mxu1 %v1145_v36 }
 0x44e   : > { %1196 = vmatpush.msrb.mxu0 %v1111_v34 }
 0x44f   : > { %1216 = vmatpush.msrb.mxu1 %v1143_v32 }
 0x450   : > { %1197 = vmatpush.msrb.mxu0 %v1109_v50 }
 0x451   : > { %1217 = vmatpush.msrb.mxu1 %v1141_v63 }
 0x452   : > { %1198 = vmatpush.msrb.mxu0 %v1107_v29 }
 0x453   : > { %1218 = vmatpush.msrb.mxu1 %v1139_v0 }
 0x454   : > { %1199 = vmatpush.msrb.mxu0 %v1105_v18 }
 0x455   : > { %1219 = vmatpush.msrb.mxu1 %v1137_v26 }
 0x456   : > { %1200 = vmatpush.msrb.mxu0 %v1103_v17 }
 0x457   : > { %1220 = vmatpush.msrb.mxu1 %v1135_v15 }
 0x458   : > { %1201 = vmatpush.msrb.mxu0 %v1101_v13 }
 0x459   : > { %1221 = vmatpush.msrb.mxu1 %v1133_v14 }
 0x45a   : > { %1202 = vmatpush.msrb.mxu0 %v1099_v11 }
 0x45b   : > { %1222 = vmatpush.msrb.mxu1 %v1131_v16 }
 0x45c   : > { %1203 = vmatpush.msrb.mxu0 %v1097_v20 }
 0x45d   : > { %1223 = vmatpush.msrb.mxu1 %v1129_v9 }
 0x45e   : > { %1204 = vmatpush.msrb.mxu0 %v1095_v12 }
 0x45f   : > { %1224 = vmatpush.msrb.mxu1 %v1127_v10 }
 0x460   : > { %1205 = vmatpush.msrb.mxu0 %v1093_v22 }
 0x461   : > { %1225 = vmatpush.msrb.mxu1 %v1125_v24 }
 0x462   : > { %1206 = vmatpush.msrb.mxu0 %v1091_v48 }
 0x463   : > { %1226 = vmatpush.msrb.mxu1 %v1123_v46 }
 0x464   : > { %1207 = vmatpush.msrb.mxu0 %v1089_v44 }
 0x465   : > { %1227 = vmatpush.msrb.mxu1 %v1121_v42  ;;  %1208 = vmatmul.f32.vlgmr.msrb.gmra.mxu0 %v2458_v62  ;;  %v1024_v62 = vld [vmem:[#allocation2] sm:$0xff] }
 0x466   : > { %1228 = vmatmul.f32.vlgmr.msrb.gmra.mxu1 %v2460_v5  ;;  %1232 = vmatpush.msra.mxu0 %v1054_v40 }
 0x467   : > { %1252 = vmatpush.msra.mxu1 %v1086_v38 }
 0x468   : > { %1233 = vmatpush.msra.mxu0 %v1052_v31 }
 0x469   : > { %1253 = vmatpush.msra.mxu1 %v1084_v33 }
 0x46a   : > { %1234 = vmatpush.msra.mxu0 %v1050_v56 }
 0x46b   : > { %1254 = vmatpush.msra.mxu1 %v1082_v30 }
 0x46c   : > { %1235 = vmatpush.msra.mxu0 %v1048_v28 }
 0x46d   : > { %1255 = vmatpush.msra.mxu1 %v1080_v27 }
 0x46e   : > { %1236 = vmatpush.msra.mxu0 %v1046_v25  ;;  %v1363_v25 = vld [vmem:[%s2558_s7 + $0x8] sm:$0xff] }
 0x46f   : > { %1256 = vmatpush.msra.mxu1 %v1078_v37  ;;  %v1365_v37 = vld [vmem:[%s2558_s7 + $0x18] sm:$0xff] }
 0x470   : > { %1237 = vmatpush.msra.mxu0 %v1044_v23  ;;  %v1367_v23 = vld [vmem:[%s2558_s7 + $0x28] sm:$0xff] }
 0x471   : > { %1257 = vmatpush.msra.mxu1 %v1076_v41 }
 0x472   : > { %1238 = vmatpush.msra.mxu0 %v1042_v43 }
 0x473   : > { %1258 = vmatpush.msra.mxu1 %v1074_v19 }
 0x474   : > { %1239 = vmatpush.msra.mxu0 %v1040_v45 }
 0x475   : > { %1259 = vmatpush.msra.mxu1 %v1072_v47  ;;  %v1369_v47 = vld [vmem:[%s2558_s7 + $0x38] sm:$0xff] }
 0x476   : > { %1240 = vmatpush.msra.mxu0 %v1038_v49 }
 0x477   : > { %1260 = vmatpush.msra.mxu1 %v1070_v51 }
 0x478   : > { %1241 = vmatpush.msra.mxu0 %v1036_v52 }
 0x479   : > { %1261 = vmatpush.msra.mxu1 %v1068_v57 }
 0x47a   : > { %1242 = vmatpush.msra.mxu0 %v1034_v58 }
 0x47b   : > { %1262 = vmatpush.msra.mxu1 %v1066_v59 }
 0x47c   : > { %1243 = vmatpush.msra.mxu0 %v1032_v60 }
 0x47d   : > { %1263 = vmatpush.msra.mxu1 %v1064_v1 }
 0x47e   : > { %1244 = vmatpush.msra.mxu0 %v1030_v2 }
 0x47f   : > { %1264 = vmatpush.msra.mxu1 %v1062_v3 }
 0x480   : > { %1245 = vmatpush.msra.mxu0 %v1028_v4 }
 0x481   : > { %1265 = vmatpush.msra.mxu1 %v1060_v53 }
 0x482   : > { %1246 = vmatpush.msra.mxu0 %v1026_v61 }
 0x483   : > { %1266 = vmatpush.msra.mxu1 %v1058_v54 }
 0x484   : > { %1247 = vmatpush.msra.mxu0 %v1024_v62 }
 0x485   : > { %1267 = vmatpush.msra.mxu1 %v1056_v39  ;;  %1248 = vmatmul.f32.vlgmr.msra.gmra.mxu0 %v2419_v35 }
 0x486   : > { %1268 = vmatmul.f32.vlgmr.msra.gmra.mxu1 %v2421_v55 }
 0x499   : > { %v1289_v35 = vpop.f32.mrf.mxu3 }
 0x49a   : > { %v1309_v55 = vpop.f32.mrf.mxu2 }
 0x4a2   : > { %v2468_v5 = vpop.f32.mrf.mxu0 }
 0x4a3   : > { %v1012_v21 = vpop.f32.mrf.mxu1 }
 0x4aa   : > { %v2470_v6 = vpop.f32.mrf.mxu0 }
 0x4ab   : > { %v1015_v7 = vpop.f32.mrf.mxu1 }
 0x4b2   : > { %v2472_v8 = vpop.f32.mrf.mxu0 }
 0x4b3   : > { %v1018_v36 = vpop.f32.mrf.mxu1 }
 0x4ba   : > { %v2474_v34 = vpop.f32.mrf.mxu0 }
 0x4bb   : > { %v1021_v32 = vpop.f32.mrf.mxu1 }
 0x4c2   : > { %v1169_v50 = vpop.f32.mrf.mxu0 }
 0x4c3   : > { %v1189_v63 = vpop.f32.mrf.mxu1 }
 0x4c4   : > { %v1190_v12 = vadd.f32 %v1189_v63, %v1169_v50  ;;  %v1366_v50 = vld [vmem:[%s2558_s7 + $0x20] sm:$0xff] }
 0x4e2   : > { %v1209_v29 = vpop.f32.mrf.mxu0 }
 0x4e3   : > { %v1229_v0 = vpop.f32.mrf.mxu1 }
 0x4e4   : > { %v1230_v18 = vadd.f32 %v1229_v0, %v1209_v29 }
 0x4e6   : > { %v1290_v26 = vadd.f32 %v1289_v35, %v1230_v18  ;;  %v1368_v35 = vld [vmem:[%s2558_s7 + $0x30] sm:$0xff] }
 0x4e8   : > { %v1310_v17 = vadd.f32 %v1309_v55, %v1290_v26 }
 0x4ea   : > { %v1313_v15 = vsub.f32 0.0, %v1310_v17 }
 0x4ec   : > { %v1316_v13 = vmul.f32 1.442695, %v1313_v15 }
 0x4ee   : > { %1641 = vpow2.f32 %v1316_v13 }
 0x4f4   : > { %v1642_v14 = vpop.eup %1641 }
 0x4f5   : > { %v1319_v11 = vadd.f32 1.0, %v1642_v14 }
 0x4f7   : > { %1643 = vrcp.f32 %v1319_v11  ;;  %v1346_v10 = vand.u32 2147483648, %v1319_v11  ;;  %v1344_v24 = vand.u32 2147483647, %v1319_v11  ;;  %vm1340_vm7 = vweird.f32 %v1319_v11 }
 0x4f9   : > { %v1347_v40 = vor.u32 1.1754944e-38, %v1346_v10  ;;  %vm1345_vm9 = vcmp.eq.f32.partialorder %v1344_v24, 8.507059e+37 }
 0x4fd   : > { %v1644_v16 = vpop.eup %1643 }
 0x4fe   : > { %v1336_v20 = vmul.f32 %v1644_v16, %v1319_v11  ;;  %vm1341_vm6 = vweird.f32 %v1644_v16 }
 0x4ff   : > { %vm1342_vm8 = vmor %vm1340_vm7, %vm1341_vm6 }
 0x500   : > { %v1337_v9 = vsub.f32 1.0, %v1336_v20 }
 0x502   : > { %v1338_v22 = vmul.f32 %v1644_v16, %v1337_v9  ;;  %v1249_v48 = vpop.f32.mrf.mxu0 }
 0x503   : > { %v1250_v46 = vadd.f32 %v1249_v48, %v1190_v12  ;;  %v1269_v42 = vpop.f32.mrf.mxu1 }
 0x504   : > { %v1339_v44 = vadd.f32 %v1644_v16, %v1338_v22 }
 0x505   : > { %v1270_v38 = vadd.f32 %v1269_v42, %v1250_v46 }
 0x506   : > { %v1343_v31 = vsel %vm1342_vm8, %v1644_v16, %v1339_v44 }
 0x507   : > { %v1348_v33 = vsel %vm1345_vm9, %v1347_v40, %v1343_v31  ;;  %v1312_v56 = vsub.f32 0.0, %v1270_v38 }
 0x508   : > { %v1351_v30 = vmul.f32 %v1348_v33, %v1310_v17 }
 0x509   : > { %v1314_v28 = vmul.f32 1.442695, %v1312_v56 }
 0x50a   : > { %v1353_v27 = vperm.slane %v1351_v30, 0 }
 0x50b   : > { %1645 = vpow2.f32 %v1314_v28 }
 0x50c   : > { %v1355_v41 = vmul.f32 %v1353_v27, %v1012_v21  ;;  %v1357_v43 = vmul.f32 %v1353_v27, %v1015_v7  ;;  %v1359_v19 = vmul.f32 %v1353_v27, %v1018_v36  ;;  %v1361_v45 = vmul.f32 %v1353_v27, %v1021_v32  ;;  %v1362_v36 = vld [vmem:[%s2558_s7] sm:$0xff]  ;;  %v1364_v32 = vld [vmem:[%s2558_s7 + $0x10] sm:$0xff] }
 0x50e   : > { %v1371_v49 = vadd.f32 %v1363_v25, %v1355_v41  ;;  %v1373_v51 = vadd.f32 %v1365_v37, %v1357_v43  ;;  %v1375_v52 = vadd.f32 %v1367_v23, %v1359_v19  ;;  %v1377_v57 = vadd.f32 %v1369_v47, %v1361_v45 }
 0x510   : > { %1379 = vst [vmem:[%s2491_s12 + $0x8] sm:$0xff] %v1371_v49 }
 0x511   : > { %v1646_v58 = vpop.eup %1645  ;;  %1381 = vst [vmem:[%s2491_s12 + $0x18] sm:$0xff] %v1373_v51 }
 0x512   : > { %1383 = vst [vmem:[%s2491_s12 + $0x28] sm:$0xff] %v1375_v52  ;;  %v1318_v59 = vadd.f32 1.0, %v1646_v58 }
 0x513   : > { %1385 = vst [vmem:[%s2491_s12 + $0x38] sm:$0xff] %v1377_v57 }
 0x514   : > { %1647 = vrcp.f32 %v1318_v59  ;;  %v1331_v3 = vand.u32 2147483648, %v1318_v59  ;;  %v1329_v53 = vand.u32 2147483647, %v1318_v59  ;;  %vm1325_vm11 = vweird.f32 %v1318_v59 }
 0x516   : > { %v1332_v54 = vor.u32 1.1754944e-38, %v1331_v3  ;;  %vm1330_vm13 = vcmp.eq.f32.partialorder %v1329_v53, 8.507059e+37 }
 0x51a   : > { %v1648_v60 = vpop.eup %1647 }
 0x51b   : > { %v1321_v1 = vmul.f32 %v1648_v60, %v1318_v59  ;;  %vm1326_vm10 = vweird.f32 %v1648_v60 }
 0x51c   : > { %vm1327_vm12 = vmor %vm1325_vm11, %vm1326_vm10 }
 0x51d   : > { %v1322_v2 = vsub.f32 1.0, %v1321_v1 }
 0x51f   : > { %v1323_v4 = vmul.f32 %v1648_v60, %v1322_v2 }
 0x521   : > { %v1324_v61 = vadd.f32 %v1648_v60, %v1323_v4 }
 0x523   : > { %v1328_v62 = vsel %vm1327_vm12, %v1648_v60, %v1324_v61 }
 0x524   : > { %v1333_v39 = vsel %vm1330_vm13, %v1332_v54, %v1328_v62 }
 0x525   : > { %v1350_v21 = vmul.f32 %v1333_v39, %v1270_v38 }
 0x527   : > { %v1352_v7 = vperm.slane %v1350_v21, 0 }
 0x529   : > { %v1354_v63 = vmul.f32 %v1352_v7, %v2468_v5  ;;  %v1356_v29 = vmul.f32 %v1352_v7, %v2470_v6  ;;  %v1358_v0 = vmul.f32 %v1352_v7, %v2472_v8  ;;  %v1360_v18 = vmul.f32 %v1352_v7, %v2474_v34 }
 0x52b   : > { %v1370_v26 = vadd.f32 %v1362_v36, %v1354_v63  ;;  %v1372_v55 = vadd.f32 %v1364_v32, %v1356_v29  ;;  %v1374_v17 = vadd.f32 %v1366_v50, %v1358_v0  ;;  %v1376_v15 = vadd.f32 %v1368_v35, %v1360_v18 }
 0x52d   : > { %1378 = vst [vmem:[%s2491_s12] sm:$0xff] %v1370_v26 }
 0x52e   : > { %1380 = vst [vmem:[%s2491_s12 + $0x10] sm:$0xff] %v1372_v55 }
 0x52f   : > { %1382 = vst [vmem:[%s2491_s12 + $0x20] sm:$0xff] %v1374_v17 }
 0x530   : > { %1384 = vst [vmem:[%s2491_s12 + $0x30] sm:$0xff] %v1376_v15 }
 0x531   : > { %1736 = shalt.err (!%p1733_p8)
}
 0x532   : > { %s1787_s19 = smov 256   ;;  %s1788_s12 = smov 16  }
 0x533   : > { %1577 = dma.vmem_to_hbm [thread:$0]  (%p1872_p5), %s1400_s13, 1024, %s1402_s18, %s1387_s20, %s1787_s19, %s1787_s19, %s1788_s12  }
 0x534 PF: > { %p1594_p9 = scmp.ge.s32.totalorder %s1779_s30, 2  ;;  %s1416_s9 = sand.u32 1, %s1767_s27  }
 0x535   : > { %s1417_s10 = scalar_lea.sflag [#allocation4], %s1416_s9 }
 0x536   : > { %p1587_p10 = pnand %p1594_p9, %p1876_p6 }
 0x538   : > { %p1588_p11 = pneg %p1587_p10 }
 0x53a   : > { %1762 = dma.done.wait (%p1588_p11), %s1417_s10, 1024  }
 0x53b   : > { %1764 = vsyncadd (%p1588_p11), %s1417_s10, 4294966272  ;;  %p20_p12 = scmp.ge.s32.totalorder %s1859_s11, 4   ;;  %s2563_s27 = smov %s1771_s28 }
 0x53c   : > { %s2564_s28 = smov %s1775_s29  ;;  %s2565_s29 = smov %s1870_s14 }
 0x53d   : > { %s2566_s30 = smov %s1859_s11  ;;  %22 = sbr.rel (!%p20_p12) target bundleno = 5 (0x5), region = 96 }
 0x542   :  { %1423 = vsyncpa [#allocation3], 1 }
 0x543   :  { %1425 = vsyncpa [#allocation3 + $0x1], 1 }
 0x544   :  { %1426 = vsyncpa [#allocation6], 1 }
 0x545   :  { %1427 = vsyncpa [#allocation4], 1 }
 0x546   :  { %1429 = vsyncpa [#allocation4 + $0x1], 1 }

</bundles_post_ra>
